<compile_context>
chip_gen: v7x
topology: tpu7x:2x2x1
jax: 0.10.0
libtpu: 0.0.40
codegen_flags: <defaults>
</compile_context>

<pallas_src>
import functools
import math

import jax
import jax.numpy as jnp
from jax import lax
from jax.experimental import pallas as pl
from jax.experimental.pallas import tpu as pltpu


def _round_up(x, m):
    return (x + m - 1) // m * m


def _pick_row_tile(R):
    """Largest convenient row tile (multiple of 8) that divides R exactly."""
    for cand in (512, 384, 256, 128, 96, 64, 48, 32, 24, 16, 8):
        if cand <= R and R % cand == 0:
            return cand
    return R  # fall back to full array (single grid step)


# --------------------------------------------------------------------------
# Kernel 1: fused LSTM.  The grid iterates sequentially over time CHUNKS.
# Per chunk: one batched input-to-hidden matmul over all chunk rows into a
# VMEM scratch, then a statically-unrolled recurrence where only the
# hidden-to-hidden matmul is on the serial path.  h/c live in VMEM scratch
# and persist across grid iterations.
# --------------------------------------------------------------------------
def _lstm_kernel(x_ref, wih_ref, bias_ref, whh_ref, h_out_ref,
                 h_sc, c_sc, gx_sc, *, time_chunk, batch, hidden):
    @pl.when(pl.program_id(0) == 0)
    def _():
        h_sc[...] = jnp.zeros_like(h_sc)
        c_sc[...] = jnp.zeros_like(c_sc)

    # Hoisted input->hidden matmul for the whole chunk (MXU sees many rows).
    gx_sc[...] = (jnp.dot(x_ref[...], wih_ref[...],
                          preferred_element_type=jnp.float32)
                  + bias_ref[...])

    B, H = batch, hidden
    whh = whh_ref[...]

    # Statically-unrolled recurrence with static slices.
    for i in range(time_chunk):
        r0 = i * B
        gates = gx_sc[r0:r0 + B, :] + jnp.dot(
            h_sc[...], whh, preferred_element_type=jnp.float32)
        # PyTorch gate order: i, f, g, o
        i_g = jax.nn.sigmoid(gates[:, 0:H])
        f_g = jax.nn.sigmoid(gates[:, H:2 * H])
        g_g = jnp.tanh(gates[:, 2 * H:3 * H])
        o_g = jax.nn.sigmoid(gates[:, 3 * H:4 * H])
        c = f_g * c_sc[...] + i_g * g_g
        h = o_g * jnp.tanh(c)
        c_sc[...] = c
        h_sc[...] = h
        h_out_ref[r0:r0 + B, :] = h


def _lstm_forward(x_flat, w_ih_t, bias, w_hh_t, *, time_chunk, batch):
    R, E = x_flat.shape
    G = w_ih_t.shape[1]
    H = w_hh_t.shape[0]
    chunk_rows = time_chunk * batch
    n_chunks = R // chunk_rows
    kernel = functools.partial(_lstm_kernel, time_chunk=time_chunk,
                               batch=batch, hidden=H)
    return pl.pallas_call(
        kernel,
        out_shape=jax.ShapeDtypeStruct((R, H), jnp.float32),
        grid_spec=pltpu.PrefetchScalarGridSpec(
            num_scalar_prefetch=0,
            grid=(n_chunks,),
            in_specs=[
                pl.BlockSpec((chunk_rows, E), lambda t: (t, 0)),
                pl.BlockSpec((E, G), lambda t: (0, 0)),
                pl.BlockSpec((1, G), lambda t: (0, 0)),
                pl.BlockSpec((H, G), lambda t: (0, 0)),
            ],
            out_specs=pl.BlockSpec((chunk_rows, H), lambda t: (t, 0)),
            scratch_shapes=[pltpu.VMEM((batch, H), jnp.float32),       # h
                            pltpu.VMEM((batch, H), jnp.float32),       # c
                            pltpu.VMEM((chunk_rows, G), jnp.float32)], # gates_x
        ),
        compiler_params=pltpu.CompilerParams(
            dimension_semantics=("arbitrary",)),
    )(x_flat, w_ih_t, bias, w_hh_t)


# --------------------------------------------------------------------------
# Kernel 2: projection head over flattened (time*batch) row tiles:
#   prj matmul -> BN(affine) -> ReLU -> fc matmul -> log_softmax -> row mask.
# P and V are padded to multiples of 128; padded vocab columns carry a -1e30
# bias so the logsumexp over the padded width is exact.
# --------------------------------------------------------------------------
def _head_kernel(h_ref, mask_ref, wprj_ref, scale_ref, shift_ref,
                 wfc_ref, bfc_ref, out_ref):
    h = h_ref[...]                                                   # (RT, H)
    p = jnp.dot(h, wprj_ref[...], preferred_element_type=jnp.float32)
    p = jnp.maximum(p * scale_ref[...] + shift_ref[...], 0.0)        # BN + ReLU
    logits = (jnp.dot(p, wfc_ref[...], preferred_element_type=jnp.float32)
              + bfc_ref[...])                                        # (RT, Vp)
    m = jnp.max(logits, axis=-1, keepdims=True)
    s = logits - m
    lse = jnp.log(jnp.sum(jnp.exp(s), axis=-1, keepdims=True))
    # pad_packed_sequence zeroing fused here (mask is (RT, 1) of 0/1).
    out_ref[...] = jnp.where(mask_ref[...] > 0.0, s - lse, 0.0)


def _head_forward(hs_flat, mask_flat, w_prj_t, bn_scale, bn_shift,
                  w_fc_t, b_fc, row_tile):
    R, H = hs_flat.shape
    Pp = w_prj_t.shape[1]
    Vp = w_fc_t.shape[1]
    return pl.pallas_call(
        _head_kernel,
        out_shape=jax.ShapeDtypeStruct((R, Vp), jnp.float32),
        grid_spec=pltpu.PrefetchScalarGridSpec(
            num_scalar_prefetch=0,
            grid=(R // row_tile,),
            in_specs=[
                pl.BlockSpec((row_tile, H), lambda i: (i, 0)),
                pl.BlockSpec((row_tile, 1), lambda i: (i, 0)),
                pl.BlockSpec((H, Pp), lambda i: (0, 0)),
                pl.BlockSpec((1, Pp), lambda i: (0, 0)),
                pl.BlockSpec((1, Pp), lambda i: (0, 0)),
                pl.BlockSpec((Pp, Vp), lambda i: (0, 0)),
                pl.BlockSpec((1, Vp), lambda i: (0, 0)),
            ],
            out_specs=pl.BlockSpec((row_tile, Vp), lambda i: (i, 0)),
        ),
        compiler_params=pltpu.CompilerParams(
            dimension_semantics=("parallel",)),
    )(hs_flat, mask_flat, w_prj_t, bn_scale, bn_shift, w_fc_t, b_fc)


# --------------------------------------------------------------------------
# Parameter preparation (pads P and V to lane-dense multiples of 128).
# --------------------------------------------------------------------------
def prepare_params(emb_table, w_ih, w_hh, b_ih, b_hh, w_prj,
                   bn_gamma, bn_beta, bn_mean, bn_var, w_fc, b_fc, eps=1e-5):
    V, E = emb_table.shape
    H = w_hh.shape[1]
    P = w_prj.shape[0]
    P_pad = _round_up(P, 128)
    V_pad = _round_up(V, 128)

    bn_scale = bn_gamma / jnp.sqrt(bn_var + eps)
    bn_shift = bn_beta - bn_mean * bn_scale

    w_prj_t = jnp.zeros((H, P_pad), jnp.float32).at[:, :P].set(w_prj.T)
    scale_p = jnp.ones((1, P_pad), jnp.float32).at[0, :P].set(bn_scale)
    shift_p = jnp.zeros((1, P_pad), jnp.float32).at[0, :P].set(bn_shift)
    w_fc_t = jnp.zeros((P_pad, V_pad), jnp.float32).at[:P, :V].set(w_fc.T)
    # Padded vocab columns get a very negative bias -> exp underflows to 0,
    # so the in-kernel logsumexp over V_pad equals the logsumexp over V.
    b_fc_p = jnp.full((1, V_pad), -1e30, jnp.float32).at[0, :V].set(b_fc)

    return {
        "emb": jnp.asarray(emb_table, jnp.float32),
        "w_ih_t": jnp.asarray(w_ih.T, jnp.float32),                # (E, 4H)
        "w_hh_t": jnp.asarray(w_hh.T, jnp.float32),                # (H, 4H)
        "lstm_bias": (b_ih + b_hh).reshape(1, 4 * H).astype(jnp.float32),
        "w_prj_t": w_prj_t,                                        # (H, P_pad)
        "bn_scale": scale_p,
        "bn_shift": shift_p,
        "w_fc_t": w_fc_t,                                          # (P_pad, V_pad)
        "b_fc": b_fc_p,
        "vocab_size": V,
    }


# --------------------------------------------------------------------------
# Full forward (glue: token concat, embedding gather, mask, reshapes).
# --------------------------------------------------------------------------
def language_model_forward(tokens, lengths, params):
    T, B = tokens.shape
    Tp1 = T + 1
    H = params["w_hh_t"].shape[0]
    V = params["vocab_size"]

    # Choose a time chunk so that chunk_rows = time_chunk * B is a multiple
    # of 8 (sublane aligned) -> no extra row padding anywhere downstream.
    base = 8 // math.gcd(B, 8)
    steps_aligned = _round_up(Tp1, base)
    if steps_aligned <= 32:
        time_chunk = steps_aligned                 # single chunk
    else:
        time_chunk = base * max(1, 16 // base)     # ~16 steps per chunk
    Tp = _round_up(Tp1, time_chunk)
    R = Tp * B

    init = jnp.zeros((1, B), tokens.dtype)
    x = jnp.concatenate([init, tokens], axis=0)                    # (Tp1, B)
    # TODO(synk): embedding gather kept in XLA; an in-kernel DMA gather only
    # pays off at realistic embedding widths.
    emb = params["emb"][x]                                         # (Tp1, B, E)
    if Tp > Tp1:
        # Trailing (global) time padding; LSTM is causal so it cannot affect
        # valid outputs, and padded rows are masked to zero in the head.
        emb = jnp.pad(emb, ((0, Tp - Tp1), (0, 0), (0, 0)))
    emb_flat = emb.reshape(R, -1)                                  # (R, E)

    # 1) Fused LSTM (input matmul + recurrence) over sequential time chunks.
    hs_flat = _lstm_forward(emb_flat, params["w_ih_t"], params["lstm_bias"],
                            params["w_hh_t"], time_chunk=time_chunk, batch=B)

    # 2) pad_packed_sequence validity mask (t < length+1 and t < T+1).
    t_idx = jnp.arange(Tp, dtype=jnp.int32)[:, None]               # (Tp, 1)
    valid = (t_idx < (lengths.astype(jnp.int32) + 1)[None, :]) & (t_idx < Tp1)
    mask_flat = valid.reshape(R, 1).astype(jnp.float32)

    # 3) Head over flattened rows with fused zeroing mask.
    row_tile = _pick_row_tile(R)
    out_flat = _head_forward(hs_flat, mask_flat, params["w_prj_t"],
                             params["bn_scale"], params["bn_shift"],
                             params["w_fc_t"], params["b_fc"], row_tile)

    out = out_flat[:, :V].reshape(Tp, B, V)[:Tp1]                  # (T+1, B, V)
    return out


# --------------------------------------------------------------------------
# Pure-JAX reference (uses the raw, unpadded parameters).
# --------------------------------------------------------------------------
def reference_forward(tokens, lengths, emb_table, w_ih, w_hh, b_ih, b_hh,
                      w_prj, bn_gamma, bn_beta, bn_mean, bn_var, w_fc, b_fc,
                      eps=1e-5):
    T, B = tokens.shape
    x = jnp.concatenate([jnp.zeros((1, B), tokens.dtype), tokens], axis=0)
    e = emb_table[x]
    H = w_hh.shape[1]
    w_ih_t = w_ih.T
    w_hh_t = w_hh.T
    bias = b_ih + b_hh

    def step(carry, xt):
        h, c = carry
        gates = xt @ w_ih_t + h @ w_hh_t + bias
        i = jax.nn.sigmoid(gates[:, :H])
        f = jax.nn.sigmoid(gates[:, H:2 * H])
        g = jnp.tanh(gates[:, 2 * H:3 * H])
        o = jax.nn.sigmoid(gates[:, 3 * H:])
        c = f * c + i * g
        h = o * jnp.tanh(c)
        return (h, c), h

    init = (jnp.zeros((B, H), jnp.float32), jnp.zeros((B, H), jnp.float32))
    _, hs = jax.lax.scan(step, init, e)
    p = hs @ w_prj.T
    scale = bn_gamma / jnp.sqrt(bn_var + eps)
    shift = bn_beta - bn_mean * scale
    p = jnp.maximum(p * scale + shift, 0.0)
    logits = p @ w_fc.T + b_fc
    lsm = jax.nn.log_softmax(logits, axis=-1)
    tpos = jnp.arange(T + 1)[:, None]
    mask = tpos < (lengths + 1)[None, :]
    return jnp.where(mask[:, :, None], lsm, 0.0)


if __name__ == "__main__":
    # Small shapes consistent with the module.
    T, B = 8, 2
    E, H, P, V = 32, 32, 16, 48          # emb, hidden, prj, vocab
    blank = 0
    eps = 1e-5

    key = jax.random.PRNGKey(0)
    ks = jax.random.split(key, 8)

    # Deterministic parameter init (shapes follow nn.Embedding / nn.LSTM /
    # nn.Linear / nn.BatchNorm1d in __init__).
    emb_table = jax.random.normal(ks[0], (V, E), jnp.float32) * 0.1
    emb_table = emb_table.at[blank].set(0.0)                 # padding_idx=blank
    w_ih = jax.random.normal(ks[1], (4 * H, E), jnp.float32) * (1.0 / jnp.sqrt(H))
    w_hh = jax.random.normal(ks[2], (4 * H, H), jnp.float32) * (1.0 / jnp.sqrt(H))
    b_ih = jax.random.normal(ks[3], (4 * H,), jnp.float32) * 0.1
    b_hh = jax.random.normal(ks[4], (4 * H,), jnp.float32) * 0.1
    w_prj = jax.random.normal(ks[5], (P, H), jnp.float32) * 0.1   # Linear(H,P,bias=False)
    w_fc = jax.random.normal(ks[6], (V, P), jnp.float32) * 0.1    # Linear(P,V)
    b_fc = jax.random.normal(ks[7], (V,), jnp.float32) * 0.1

    # BatchNorm1d(P) default params, eval mode.
    bn_gamma = jnp.ones((P,), jnp.float32)
    bn_beta = jnp.zeros((P,), jnp.float32)
    bn_mean = jnp.zeros((P,), jnp.float32)
    bn_var = jnp.ones((P,), jnp.float32)

    params = prepare_params(emb_table, w_ih, w_hh, b_ih, b_hh, w_prj,
                            bn_gamma, bn_beta, bn_mean, bn_var, w_fc, b_fc, eps)

    # Deterministic example inputs.
    ik = jax.random.PRNGKey(1)
    tokens = jax.random.randint(ik, (T, B), 1, V, dtype=jnp.int32)   # (T, B)
    lengths = jnp.array([T, T - 3], dtype=jnp.int32)                 # max == T

    out = jax.block_until_ready(language_model_forward(tokens, lengths, params))
    ref = jax.block_until_ready(
        reference_forward(tokens, lengths, emb_table, w_ih, w_hh, b_ih, b_hh,
                          w_prj, bn_gamma, bn_beta, bn_mean, bn_var, w_fc, b_fc,
                          eps))

    assert out.shape == (T + 1, B, V), out.shape
    assert jnp.allclose(out, ref, atol=1e-2, rtol=1e-2), (
        "mismatch vs reference: max abs diff = %e"
        % float(jnp.max(jnp.abs(out - ref))))

    print("KERNEL_OK")
</pallas_src>

<mosaic_0001>
module attributes {stable_mosaic.version = 11 : i64} {
  func.func @_lstm_kernel(%arg0: i32, %arg1: memref<24x32xf32, #tpu.memory_space<vmem>>, %arg2: memref<32x128xf32, #tpu.memory_space<vmem>>, %arg3: memref<1x128xf32, #tpu.memory_space<vmem>>, %arg4: memref<32x128xf32, #tpu.memory_space<vmem>>, %arg5: memref<24x32xf32, #tpu.memory_space<vmem>>, %arg6: memref<2x32xf32, #tpu.memory_space<vmem>>, %arg7: memref<2x32xf32, #tpu.memory_space<vmem>>, %arg8: memref<24x128xf32, #tpu.memory_space<vmem>>) attributes {dimension_semantics = [#tpu.dimension_semantics<arbitrary>], iteration_bounds = array<i64: 1>, scalar_prefetch = 0 : i64, scratch_operands = 3 : i64, tpu.core_type = #tpu.core_type<tc>, window_params = [{transform_indices = @transform_0, window_bounds = array<i64: 24, 32>}, {pipeline_mode = #tpu.pipeline_mode<synchronous>, transform_indices = @transform_1, window_bounds = array<i64: 32, 128>}, {pipeline_mode = #tpu.pipeline_mode<synchronous>, transform_indices = @transform_2, window_bounds = array<i64: 1, 128>}, {pipeline_mode = #tpu.pipeline_mode<synchronous>, transform_indices = @transform_3, window_bounds = array<i64: 32, 128>}, {transform_indices = @transform_4, window_bounds = array<i64: 24, 32>}]} {
    %c0_i32 = arith.constant 0 : i32
    %0 = arith.cmpi eq, %arg0, %c0_i32 : i32
    %1 = arith.extui %0 : i1 to i32
    %c0_i32_0 = arith.constant 0 : i32
    %2 = arith.cmpi ne, %1, %c0_i32_0 : i32
    scf.if %2 {
      %cst_191 = arith.constant 0.000000e+00 : f32
      %407 = vector.broadcast %cst_191 : f32 to vector<2x32xf32>
      %c0_192 = arith.constant 0 : index
      %c0_193 = arith.constant 0 : index
      %408 = vector.load %arg6[%c0_192, %c0_193] : memref<2x32xf32, #tpu.memory_space<vmem>>, vector<2x32xf32>
      tpu.vector_store %arg6[%c0_192, %c0_193], %407 {strides = array<i32>} : memref<2x32xf32, #tpu.memory_space<vmem>>, vector<2x32xf32>,
      %cst_194 = arith.constant 0.000000e+00 : f32
      %409 = vector.broadcast %cst_194 : f32 to vector<2x32xf32>
      %c0_195 = arith.constant 0 : index
      %c0_196 = arith.constant 0 : index
      %410 = vector.load %arg7[%c0_195, %c0_196] : memref<2x32xf32, #tpu.memory_space<vmem>>, vector<2x32xf32>
      tpu.vector_store %arg7[%c0_195, %c0_196], %409 {strides = array<i32>} : memref<2x32xf32, #tpu.memory_space<vmem>>, vector<2x32xf32>,
    } else {
    }
    %c0 = arith.constant 0 : index
    %c0_1 = arith.constant 0 : index
    %3 = vector.load %arg1[%c0, %c0_1] : memref<24x32xf32, #tpu.memory_space<vmem>>, vector<24x32xf32>
    %c0_2 = arith.constant 0 : index
    %c0_3 = arith.constant 0 : index
    %4 = vector.load %arg2[%c0_2, %c0_3] : memref<32x128xf32, #tpu.memory_space<vmem>>, vector<32x128xf32>
    %cst = arith.constant dense<0.000000e+00> : vector<24x128xf32>
    %5 = tpu.matmul %3, %4, %cst {dimension_numbers = #tpu.dot_dimension_numbers<[1], [0], [0], [1], [0, 0, 1, 1], [], []>} : vector<24x32xf32>, vector<32x128xf32>, vector<24x128xf32> -> vector<24x128xf32>
    %c0_4 = arith.constant 0 : index
    %c0_5 = arith.constant 0 : index
    %6 = vector.load %arg3[%c0_4, %c0_5] : memref<1x128xf32, #tpu.memory_space<vmem>>, vector<1x128xf32>
    %7 = vector.broadcast %6 : vector<1x128xf32> to vector<24x128xf32>
    %8 = arith.addf %5, %7 : vector<24x128xf32>
    %c0_6 = arith.constant 0 : index
    %c0_7 = arith.constant 0 : index
    %9 = vector.load %arg8[%c0_6, %c0_7] : memref<24x128xf32, #tpu.memory_space<vmem>>, vector<24x128xf32>
    tpu.vector_store %arg8[%c0_6, %c0_7], %8 {strides = array<i32>} : memref<24x128xf32, #tpu.memory_space<vmem>>, vector<24x128xf32>,
    %c0_8 = arith.constant 0 : index
    %c0_9 = arith.constant 0 : index
    %10 = vector.load %arg4[%c0_8, %c0_9] : memref<32x128xf32, #tpu.memory_space<vmem>>, vector<32x128xf32>
    %c0_10 = arith.constant 0 : index
    %c0_11 = arith.constant 0 : index
    %11 = vector.load %arg8[%c0_10, %c0_11] : memref<24x128xf32, #tpu.memory_space<vmem>>, vector<2x128xf32>
    %c0_12 = arith.constant 0 : index
    %c0_13 = arith.constant 0 : index
    %12 = vector.load %arg6[%c0_12, %c0_13] : memref<2x32xf32, #tpu.memory_space<vmem>>, vector<2x32xf32>
    %cst_14 = arith.constant dense<0.000000e+00> : vector<2x128xf32>
    %13 = tpu.matmul %12, %10, %cst_14 {dimension_numbers = #tpu.dot_dimension_numbers<[1], [0], [0], [1], [0, 0, 1, 1], [], []>} : vector<2x32xf32>, vector<32x128xf32>, vector<2x128xf32> -> vector<2x128xf32>
    %14 = arith.addf %11, %13 : vector<2x128xf32>
    %15 = vector.extract_strided_slice %14 {offsets = [0, 0], sizes = [2, 32], strides = [1, 1]} : vector<2x128xf32> to vector<2x32xf32>
    %16 = arith.negf %15 : vector<2x32xf32>
    %17 = math.exp %16 : vector<2x32xf32>
    %cst_15 = arith.constant 1.000000e+00 : f32
    %18 = vector.broadcast %cst_15 : f32 to vector<2x32xf32>
    %19 = arith.addf %18, %17 : vector<2x32xf32>
    %20 = arith.divf %18, %19 : vector<2x32xf32>
    %21 = vector.extract_strided_slice %14 {offsets = [0, 32], sizes = [2, 32], strides = [1, 1]} : vector<2x128xf32> to vector<2x32xf32>
    %22 = arith.negf %21 : vector<2x32xf32>
    %23 = math.exp %22 : vector<2x32xf32>
    %cst_16 = arith.constant 1.000000e+00 : f32
    %24 = vector.broadcast %cst_16 : f32 to vector<2x32xf32>
    %25 = arith.addf %24, %23 : vector<2x32xf32>
    %26 = arith.divf %24, %25 : vector<2x32xf32>
    %27 = vector.extract_strided_slice %14 {offsets = [0, 64], sizes = [2, 32], strides = [1, 1]} : vector<2x128xf32> to vector<2x32xf32>
    %28 = math.tanh %27 : vector<2x32xf32>
    %29 = vector.extract_strided_slice %14 {offsets = [0, 96], sizes = [2, 32], strides = [1, 1]} : vector<2x128xf32> to vector<2x32xf32>
    %30 = arith.negf %29 : vector<2x32xf32>
    %31 = math.exp %30 : vector<2x32xf32>
    %cst_17 = arith.constant 1.000000e+00 : f32
    %32 = vector.broadcast %cst_17 : f32 to vector<2x32xf32>
    %33 = arith.addf %32, %31 : vector<2x32xf32>
    %34 = arith.divf %32, %33 : vector<2x32xf32>
    %c0_18 = arith.constant 0 : index
    %c0_19 = arith.constant 0 : index
    %35 = vector.load %arg7[%c0_18, %c0_19] : memref<2x32xf32, #tpu.memory_space<vmem>>, vector<2x32xf32>
    %36 = arith.mulf %26, %35 : vector<2x32xf32>
    %37 = arith.mulf %20, %28 : vector<2x32xf32>
    %38 = arith.addf %36, %37 : vector<2x32xf32>
    %39 = math.tanh %38 : vector<2x32xf32>
    %40 = arith.mulf %34, %39 : vector<2x32xf32>
    %c0_20 = arith.constant 0 : index
    %c0_21 = arith.constant 0 : index
    %41 = vector.load %arg7[%c0_20, %c0_21] : memref<2x32xf32, #tpu.memory_space<vmem>>, vector<2x32xf32>
    tpu.vector_store %arg7[%c0_20, %c0_21], %38 {strides = array<i32>} : memref<2x32xf32, #tpu.memory_space<vmem>>, vector<2x32xf32>,
    %c0_22 = arith.constant 0 : index
    %c0_23 = arith.constant 0 : index
    %42 = vector.load %arg6[%c0_22, %c0_23] : memref<2x32xf32, #tpu.memory_space<vmem>>, vector<2x32xf32>
    tpu.vector_store %arg6[%c0_22, %c0_23], %40 {strides = array<i32>} : memref<2x32xf32, #tpu.memory_space<vmem>>, vector<2x32xf32>,
    %c0_24 = arith.constant 0 : index
    %c0_25 = arith.constant 0 : index
    %43 = vector.load %arg5[%c0_24, %c0_25] : memref<24x32xf32, #tpu.memory_space<vmem>>, vector<2x32xf32>
    tpu.vector_store %arg5[%c0_24, %c0_25], %40 {strides = array<i32>} : memref<24x32xf32, #tpu.memory_space<vmem>>, vector<2x32xf32>,
    %c2 = arith.constant 2 : index
    %c0_26 = arith.constant 0 : index
    %44 = vector.load %arg8[%c2, %c0_26] : memref<24x128xf32, #tpu.memory_space<vmem>>, vector<2x128xf32>
    %c0_27 = arith.constant 0 : index
    %c0_28 = arith.constant 0 : index
    %45 = vector.load %arg6[%c0_27, %c0_28] : memref<2x32xf32, #tpu.memory_space<vmem>>, vector<2x32xf32>
    %cst_29 = arith.constant dense<0.000000e+00> : vector<2x128xf32>
    %46 = tpu.matmul %45, %10, %cst_29 {dimension_numbers = #tpu.dot_dimension_numbers<[1], [0], [0], [1], [0, 0, 1, 1], [], []>} : vector<2x32xf32>, vector<32x128xf32>, vector<2x128xf32> -> vector<2x128xf32>
    %47 = arith.addf %44, %46 : vector<2x128xf32>
    %48 = vector.extract_strided_slice %47 {offsets = [0, 0], sizes = [2, 32], strides = [1, 1]} : vector<2x128xf32> to vector<2x32xf32>
    %49 = arith.negf %48 : vector<2x32xf32>
    %50 = math.exp %49 : vector<2x32xf32>
    %cst_30 = arith.constant 1.000000e+00 : f32
    %51 = vector.broadcast %cst_30 : f32 to vector<2x32xf32>
    %52 = arith.addf %51, %50 : vector<2x32xf32>
    %53 = arith.divf %51, %52 : vector<2x32xf32>
    %54 = vector.extract_strided_slice %47 {offsets = [0, 32], sizes = [2, 32], strides = [1, 1]} : vector<2x128xf32> to vector<2x32xf32>
    %55 = arith.negf %54 : vector<2x32xf32>
    %56 = math.exp %55 : vector<2x32xf32>
    %cst_31 = arith.constant 1.000000e+00 : f32
    %57 = vector.broadcast %cst_31 : f32 to vector<2x32xf32>
    %58 = arith.addf %57, %56 : vector<2x32xf32>
    %59 = arith.divf %57, %58 : vector<2x32xf32>
    %60 = vector.extract_strided_slice %47 {offsets = [0, 64], sizes = [2, 32], strides = [1, 1]} : vector<2x128xf32> to vector<2x32xf32>
    %61 = math.tanh %60 : vector<2x32xf32>
    %62 = vector.extract_strided_slice %47 {offsets = [0, 96], sizes = [2, 32], strides = [1, 1]} : vector<2x128xf32> to vector<2x32xf32>
    %63 = arith.negf %62 : vector<2x32xf32>
    %64 = math.exp %63 : vector<2x32xf32>
    %cst_32 = arith.constant 1.000000e+00 : f32
    %65 = vector.broadcast %cst_32 : f32 to vector<2x32xf32>
    %66 = arith.addf %65, %64 : vector<2x32xf32>
    %67 = arith.divf %65, %66 : vector<2x32xf32>
    %c0_33 = arith.constant 0 : index
    %c0_34 = arith.constant 0 : index
    %68 = vector.load %arg7[%c0_33, %c0_34] : memref<2x32xf32, #tpu.memory_space<vmem>>, vector<2x32xf32>
    %69 = arith.mulf %59, %68 : vector<2x32xf32>
    %70 = arith.mulf %53, %61 : vector<2x32xf32>
    %71 = arith.addf %69, %70 : vector<2x32xf32>
    %72 = math.tanh %71 : vector<2x32xf32>
    %73 = arith.mulf %67, %72 : vector<2x32xf32>
    %c0_35 = arith.constant 0 : index
    %c0_36 = arith.constant 0 : index
    %74 = vector.load %arg7[%c0_35, %c0_36] : memref<2x32xf32, #tpu.memory_space<vmem>>, vector<2x32xf32>
    tpu.vector_store %arg7[%c0_35, %c0_36], %71 {strides = array<i32>} : memref<2x32xf32, #tpu.memory_space<vmem>>, vector<2x32xf32>,
    %c0_37 = arith.constant 0 : index
    %c0_38 = arith.constant 0 : index
    %75 = vector.load %arg6[%c0_37, %c0_38] : memref<2x32xf32, #tpu.memory_space<vmem>>, vector<2x32xf32>
    tpu.vector_store %arg6[%c0_37, %c0_38], %73 {strides = array<i32>} : memref<2x32xf32, #tpu.memory_space<vmem>>, vector<2x32xf32>,
    %c2_39 = arith.constant 2 : index
    %c0_40 = arith.constant 0 : index
    %76 = vector.load %arg5[%c2_39, %c0_40] : memref<24x32xf32, #tpu.memory_space<vmem>>, vector<2x32xf32>
    tpu.vector_store %arg5[%c2_39, %c0_40], %73 {strides = array<i32>} : memref<24x32xf32, #tpu.memory_space<vmem>>, vector<2x32xf32>,
    %c4 = arith.constant 4 : index
    %c0_41 = arith.constant 0 : index
    %77 = vector.load %arg8[%c4, %c0_41] : memref<24x128xf32, #tpu.memory_space<vmem>>, vector<2x128xf32>
    %c0_42 = arith.constant 0 : index
    %c0_43 = arith.constant 0 : index
    %78 = vector.load %arg6[%c0_42, %c0_43] : memref<2x32xf32, #tpu.memory_space<vmem>>, vector<2x32xf32>
    %cst_44 = arith.constant dense<0.000000e+00> : vector<2x128xf32>
    %79 = tpu.matmul %78, %10, %cst_44 {dimension_numbers = #tpu.dot_dimension_numbers<[1], [0], [0], [1], [0, 0, 1, 1], [], []>} : vector<2x32xf32>, vector<32x128xf32>, vector<2x128xf32> -> vector<2x128xf32>
    %80 = arith.addf %77, %79 : vector<2x128xf32>
    %81 = vector.extract_strided_slice %80 {offsets = [0, 0], sizes = [2, 32], strides = [1, 1]} : vector<2x128xf32> to vector<2x32xf32>
    %82 = arith.negf %81 : vector<2x32xf32>
    %83 = math.exp %82 : vector<2x32xf32>
    %cst_45 = arith.constant 1.000000e+00 : f32
    %84 = vector.broadcast %cst_45 : f32 to vector<2x32xf32>
    %85 = arith.addf %84, %83 : vector<2x32xf32>
    %86 = arith.divf %84, %85 : vector<2x32xf32>
    %87 = vector.extract_strided_slice %80 {offsets = [0, 32], sizes = [2, 32], strides = [1, 1]} : vector<2x128xf32> to vector<2x32xf32>
    %88 = arith.negf %87 : vector<2x32xf32>
    %89 = math.exp %88 : vector<2x32xf32>
    %cst_46 = arith.constant 1.000000e+00 : f32
    %90 = vector.broadcast %cst_46 : f32 to vector<2x32xf32>
    %91 = arith.addf %90, %89 : vector<2x32xf32>
    %92 = arith.divf %90, %91 : vector<2x32xf32>
    %93 = vector.extract_strided_slice %80 {offsets = [0, 64], sizes = [2, 32], strides = [1, 1]} : vector<2x128xf32> to vector<2x32xf32>
    %94 = math.tanh %93 : vector<2x32xf32>
    %95 = vector.extract_strided_slice %80 {offsets = [0, 96], sizes = [2, 32], strides = [1, 1]} : vector<2x128xf32> to vector<2x32xf32>
    %96 = arith.negf %95 : vector<2x32xf32>
    %97 = math.exp %96 : vector<2x32xf32>
    %cst_47 = arith.constant 1.000000e+00 : f32
    %98 = vector.broadcast %cst_47 : f32 to vector<2x32xf32>
    %99 = arith.addf %98, %97 : vector<2x32xf32>
    %100 = arith.divf %98, %99 : vector<2x32xf32>
    %c0_48 = arith.constant 0 : index
    %c0_49 = arith.constant 0 : index
    %101 = vector.load %arg7[%c0_48, %c0_49] : memref<2x32xf32, #tpu.memory_space<vmem>>, vector<2x32xf32>
    %102 = arith.mulf %92, %101 : vector<2x32xf32>
    %103 = arith.mulf %86, %94 : vector<2x32xf32>
    %104 = arith.addf %102, %103 : vector<2x32xf32>
    %105 = math.tanh %104 : vector<2x32xf32>
    %106 = arith.mulf %100, %105 : vector<2x32xf32>
    %c0_50 = arith.constant 0 : index
    %c0_51 = arith.constant 0 : index
    %107 = vector.load %arg7[%c0_50, %c0_51] : memref<2x32xf32, #tpu.memory_space<vmem>>, vector<2x32xf32>
    tpu.vector_store %arg7[%c0_50, %c0_51], %104 {strides = array<i32>} : memref<2x32xf32, #tpu.memory_space<vmem>>, vector<2x32xf32>,
    %c0_52 = arith.constant 0 : index
    %c0_53 = arith.constant 0 : index
    %108 = vector.load %arg6[%c0_52, %c0_53] : memref<2x32xf32, #tpu.memory_space<vmem>>, vector<2x32xf32>
    tpu.vector_store %arg6[%c0_52, %c0_53], %106 {strides = array<i32>} : memref<2x32xf32, #tpu.memory_space<vmem>>, vector<2x32xf32>,
    %c4_54 = arith.constant 4 : index
    %c0_55 = arith.constant 0 : index
    %109 = vector.load %arg5[%c4_54, %c0_55] : memref<24x32xf32, #tpu.memory_space<vmem>>, vector<2x32xf32>
    tpu.vector_store %arg5[%c4_54, %c0_55], %106 {strides = array<i32>} : memref<24x32xf32, #tpu.memory_space<vmem>>, vector<2x32xf32>,
    %c6 = arith.constant 6 : index
    %c0_56 = arith.constant 0 : index
    %110 = vector.load %arg8[%c6, %c0_56] : memref<24x128xf32, #tpu.memory_space<vmem>>, vector<2x128xf32>
    %c0_57 = arith.constant 0 : index
    %c0_58 = arith.constant 0 : index
    %111 = vector.load %arg6[%c0_57, %c0_58] : memref<2x32xf32, #tpu.memory_space<vmem>>, vector<2x32xf32>
    %cst_59 = arith.constant dense<0.000000e+00> : vector<2x128xf32>
    %112 = tpu.matmul %111, %10, %cst_59 {dimension_numbers = #tpu.dot_dimension_numbers<[1], [0], [0], [1], [0, 0, 1, 1], [], []>} : vector<2x32xf32>, vector<32x128xf32>, vector<2x128xf32> -> vector<2x128xf32>
    %113 = arith.addf %110, %112 : vector<2x128xf32>
    %114 = vector.extract_strided_slice %113 {offsets = [0, 0], sizes = [2, 32], strides = [1, 1]} : vector<2x128xf32> to vector<2x32xf32>
    %115 = arith.negf %114 : vector<2x32xf32>
    %116 = math.exp %115 : vector<2x32xf32>
    %cst_60 = arith.constant 1.000000e+00 : f32
    %117 = vector.broadcast %cst_60 : f32 to vector<2x32xf32>
    %118 = arith.addf %117, %116 : vector<2x32xf32>
    %119 = arith.divf %117, %118 : vector<2x32xf32>
    %120 = vector.extract_strided_slice %113 {offsets = [0, 32], sizes = [2, 32], strides = [1, 1]} : vector<2x128xf32> to vector<2x32xf32>
    %121 = arith.negf %120 : vector<2x32xf32>
    %122 = math.exp %121 : vector<2x32xf32>
    %cst_61 = arith.constant 1.000000e+00 : f32
    %123 = vector.broadcast %cst_61 : f32 to vector<2x32xf32>
    %124 = arith.addf %123, %122 : vector<2x32xf32>
    %125 = arith.divf %123, %124 : vector<2x32xf32>
    %126 = vector.extract_strided_slice %113 {offsets = [0, 64], sizes = [2, 32], strides = [1, 1]} : vector<2x128xf32> to vector<2x32xf32>
    %127 = math.tanh %126 : vector<2x32xf32>
    %128 = vector.extract_strided_slice %113 {offsets = [0, 96], sizes = [2, 32], strides = [1, 1]} : vector<2x128xf32> to vector<2x32xf32>
    %129 = arith.negf %128 : vector<2x32xf32>
    %130 = math.exp %129 : vector<2x32xf32>
    %cst_62 = arith.constant 1.000000e+00 : f32
    %131 = vector.broadcast %cst_62 : f32 to vector<2x32xf32>
    %132 = arith.addf %131, %130 : vector<2x32xf32>
    %133 = arith.divf %131, %132 : vector<2x32xf32>
    %c0_63 = arith.constant 0 : index
    %c0_64 = arith.constant 0 : index
    %134 = vector.load %arg7[%c0_63, %c0_64] : memref<2x32xf32, #tpu.memory_space<vmem>>, vector<2x32xf32>
    %135 = arith.mulf %125, %134 : vector<2x32xf32>
    %136 = arith.mulf %119, %127 : vector<2x32xf32>
    %137 = arith.addf %135, %136 : vector<2x32xf32>
    %138 = math.tanh %137 : vector<2x32xf32>
    %139 = arith.mulf %133, %138 : vector<2x32xf32>
    %c0_65 = arith.constant 0 : index
    %c0_66 = arith.constant 0 : index
    %140 = vector.load %arg7[%c0_65, %c0_66] : memref<2x32xf32, #tpu.memory_space<vmem>>, vector<2x32xf32>
    tpu.vector_store %arg7[%c0_65, %c0_66], %137 {strides = array<i32>} : memref<2x32xf32, #tpu.memory_space<vmem>>, vector<2x32xf32>,
    %c0_67 = arith.constant 0 : index
    %c0_68 = arith.constant 0 : index
    %141 = vector.load %arg6[%c0_67, %c0_68] : memref<2x32xf32, #tpu.memory_space<vmem>>, vector<2x32xf32>
    tpu.vector_store %arg6[%c0_67, %c0_68], %139 {strides = array<i32>} : memref<2x32xf32, #tpu.memory_space<vmem>>, vector<2x32xf32>,
    %c6_69 = arith.constant 6 : index
    %c0_70 = arith.constant 0 : index
    %142 = vector.load %arg5[%c6_69, %c0_70] : memref<24x32xf32, #tpu.memory_space<vmem>>, vector<2x32xf32>
    tpu.vector_store %arg5[%c6_69, %c0_70], %139 {strides = array<i32>} : memref<24x32xf32, #tpu.memory_space<vmem>>, vector<2x32xf32>,
    %c8 = arith.constant 8 : index
    %c0_71 = arith.constant 0 : index
    %143 = vector.load %arg8[%c8, %c0_71] : memref<24x128xf32, #tpu.memory_space<vmem>>, vector<2x128xf32>
    %c0_72 = arith.constant 0 : index
    %c0_73 = arith.constant 0 : index
    %144 = vector.load %arg6[%c0_72, %c0_73] : memref<2x32xf32, #tpu.memory_space<vmem>>, vector<2x32xf32>
    %cst_74 = arith.constant dense<0.000000e+00> : vector<2x128xf32>
    %145 = tpu.matmul %144, %10, %cst_74 {dimension_numbers = #tpu.dot_dimension_numbers<[1], [0], [0], [1], [0, 0, 1, 1], [], []>} : vector<2x32xf32>, vector<32x128xf32>, vector<2x128xf32> -> vector<2x128xf32>
    %146 = arith.addf %143, %145 : vector<2x128xf32>
    %147 = vector.extract_strided_slice %146 {offsets = [0, 0], sizes = [2, 32], strides = [1, 1]} : vector<2x128xf32> to vector<2x32xf32>
    %148 = arith.negf %147 : vector<2x32xf32>
    %149 = math.exp %148 : vector<2x32xf32>
    %cst_75 = arith.constant 1.000000e+00 : f32
    %150 = vector.broadcast %cst_75 : f32 to vector<2x32xf32>
    %151 = arith.addf %150, %149 : vector<2x32xf32>
    %152 = arith.divf %150, %151 : vector<2x32xf32>
    %153 = vector.extract_strided_slice %146 {offsets = [0, 32], sizes = [2, 32], strides = [1, 1]} : vector<2x128xf32> to vector<2x32xf32>
    %154 = arith.negf %153 : vector<2x32xf32>
    %155 = math.exp %154 : vector<2x32xf32>
    %cst_76 = arith.constant 1.000000e+00 : f32
    %156 = vector.broadcast %cst_76 : f32 to vector<2x32xf32>
    %157 = arith.addf %156, %155 : vector<2x32xf32>
    %158 = arith.divf %156, %157 : vector<2x32xf32>
    %159 = vector.extract_strided_slice %146 {offsets = [0, 64], sizes = [2, 32], strides = [1, 1]} : vector<2x128xf32> to vector<2x32xf32>
    %160 = math.tanh %159 : vector<2x32xf32>
    %161 = vector.extract_strided_slice %146 {offsets = [0, 96], sizes = [2, 32], strides = [1, 1]} : vector<2x128xf32> to vector<2x32xf32>
    %162 = arith.negf %161 : vector<2x32xf32>
    %163 = math.exp %162 : vector<2x32xf32>
    %cst_77 = arith.constant 1.000000e+00 : f32
    %164 = vector.broadcast %cst_77 : f32 to vector<2x32xf32>
    %165 = arith.addf %164, %163 : vector<2x32xf32>
    %166 = arith.divf %164, %165 : vector<2x32xf32>
    %c0_78 = arith.constant 0 : index
    %c0_79 = arith.constant 0 : index
    %167 = vector.load %arg7[%c0_78, %c0_79] : memref<2x32xf32, #tpu.memory_space<vmem>>, vector<2x32xf32>
    %168 = arith.mulf %158, %167 : vector<2x32xf32>
    %169 = arith.mulf %152, %160 : vector<2x32xf32>
    %170 = arith.addf %168, %169 : vector<2x32xf32>
    %171 = math.tanh %170 : vector<2x32xf32>
    %172 = arith.mulf %166, %171 : vector<2x32xf32>
    %c0_80 = arith.constant 0 : index
    %c0_81 = arith.constant 0 : index
    %173 = vector.load %arg7[%c0_80, %c0_81] : memref<2x32xf32, #tpu.memory_space<vmem>>, vector<2x32xf32>
    tpu.vector_store %arg7[%c0_80, %c0_81], %170 {strides = array<i32>} : memref<2x32xf32, #tpu.memory_space<vmem>>, vector<2x32xf32>,
    %c0_82 = arith.constant 0 : index
    %c0_83 = arith.constant 0 : index
    %174 = vector.load %arg6[%c0_82, %c0_83] : memref<2x32xf32, #tpu.memory_space<vmem>>, vector<2x32xf32>
    tpu.vector_store %arg6[%c0_82, %c0_83], %172 {strides = array<i32>} : memref<2x32xf32, #tpu.memory_space<vmem>>, vector<2x32xf32>,
    %c8_84 = arith.constant 8 : index
    %c0_85 = arith.constant 0 : index
    %175 = vector.load %arg5[%c8_84, %c0_85] : memref<24x32xf32, #tpu.memory_space<vmem>>, vector<2x32xf32>
    tpu.vector_store %arg5[%c8_84, %c0_85], %172 {strides = array<i32>} : memref<24x32xf32, #tpu.memory_space<vmem>>, vector<2x32xf32>,
    %c10 = arith.constant 10 : index
    %c0_86 = arith.constant 0 : index
    %176 = vector.load %arg8[%c10, %c0_86] : memref<24x128xf32, #tpu.memory_space<vmem>>, vector<2x128xf32>
    %c0_87 = arith.constant 0 : index
    %c0_88 = arith.constant 0 : index
    %177 = vector.load %arg6[%c0_87, %c0_88] : memref<2x32xf32, #tpu.memory_space<vmem>>, vector<2x32xf32>
    %cst_89 = arith.constant dense<0.000000e+00> : vector<2x128xf32>
    %178 = tpu.matmul %177, %10, %cst_89 {dimension_numbers = #tpu.dot_dimension_numbers<[1], [0], [0], [1], [0, 0, 1, 1], [], []>} : vector<2x32xf32>, vector<32x128xf32>, vector<2x128xf32> -> vector<2x128xf32>
    %179 = arith.addf %176, %178 : vector<2x128xf32>
    %180 = vector.extract_strided_slice %179 {offsets = [0, 0], sizes = [2, 32], strides = [1, 1]} : vector<2x128xf32> to vector<2x32xf32>
    %181 = arith.negf %180 : vector<2x32xf32>
    %182 = math.exp %181 : vector<2x32xf32>
    %cst_90 = arith.constant 1.000000e+00 : f32
    %183 = vector.broadcast %cst_90 : f32 to vector<2x32xf32>
    %184 = arith.addf %183, %182 : vector<2x32xf32>
    %185 = arith.divf %183, %184 : vector<2x32xf32>
    %186 = vector.extract_strided_slice %179 {offsets = [0, 32], sizes = [2, 32], strides = [1, 1]} : vector<2x128xf32> to vector<2x32xf32>
    %187 = arith.negf %186 : vector<2x32xf32>
    %188 = math.exp %187 : vector<2x32xf32>
    %cst_91 = arith.constant 1.000000e+00 : f32
    %189 = vector.broadcast %cst_91 : f32 to vector<2x32xf32>
    %190 = arith.addf %189, %188 : vector<2x32xf32>
    %191 = arith.divf %189, %190 : vector<2x32xf32>
    %192 = vector.extract_strided_slice %179 {offsets = [0, 64], sizes = [2, 32], strides = [1, 1]} : vector<2x128xf32> to vector<2x32xf32>
    %193 = math.tanh %192 : vector<2x32xf32>
    %194 = vector.extract_strided_slice %179 {offsets = [0, 96], sizes = [2, 32], strides = [1, 1]} : vector<2x128xf32> to vector<2x32xf32>
    %195 = arith.negf %194 : vector<2x32xf32>
    %196 = math.exp %195 : vector<2x32xf32>
    %cst_92 = arith.constant 1.000000e+00 : f32
    %197 = vector.broadcast %cst_92 : f32 to vector<2x32xf32>
    %198 = arith.addf %197, %196 : vector<2x32xf32>
    %199 = arith.divf %197, %198 : vector<2x32xf32>
    %c0_93 = arith.constant 0 : index
    %c0_94 = arith.constant 0 : index
    %200 = vector.load %arg7[%c0_93, %c0_94] : memref<2x32xf32, #tpu.memory_space<vmem>>, vector<2x32xf32>
    %201 = arith.mulf %191, %200 : vector<2x32xf32>
    %202 = arith.mulf %185, %193 : vector<2x32xf32>
    %203 = arith.addf %201, %202 : vector<2x32xf32>
    %204 = math.tanh %203 : vector<2x32xf32>
    %205 = arith.mulf %199, %204 : vector<2x32xf32>
    %c0_95 = arith.constant 0 : index
    %c0_96 = arith.constant 0 : index
    %206 = vector.load %arg7[%c0_95, %c0_96] : memref<2x32xf32, #tpu.memory_space<vmem>>, vector<2x32xf32>
    tpu.vector_store %arg7[%c0_95, %c0_96], %203 {strides = array<i32>} : memref<2x32xf32, #tpu.memory_space<vmem>>, vector<2x32xf32>,
    %c0_97 = arith.constant 0 : index
    %c0_98 = arith.constant 0 : index
    %207 = vector.load %arg6[%c0_97, %c0_98] : memref<2x32xf32, #tpu.memory_space<vmem>>, vector<2x32xf32>
    tpu.vector_store %arg6[%c0_97, %c0_98], %205 {strides = array<i32>} : memref<2x32xf32, #tpu.memory_space<vmem>>, vector<2x32xf32>,
    %c10_99 = arith.constant 10 : index
    %c0_100 = arith.constant 0 : index
    %208 = vector.load %arg5[%c10_99, %c0_100] : memref<24x32xf32, #tpu.memory_space<vmem>>, vector<2x32xf32>
    tpu.vector_store %arg5[%c10_99, %c0_100], %205 {strides = array<i32>} : memref<24x32xf32, #tpu.memory_space<vmem>>, vector<2x32xf32>,
    %c12 = arith.constant 12 : index
    %c0_101 = arith.constant 0 : index
    %209 = vector.load %arg8[%c12, %c0_101] : memref<24x128xf32, #tpu.memory_space<vmem>>, vector<2x128xf32>
    %c0_102 = arith.constant 0 : index
    %c0_103 = arith.constant 0 : index
    %210 = vector.load %arg6[%c0_102, %c0_103] : memref<2x32xf32, #tpu.memory_space<vmem>>, vector<2x32xf32>
    %cst_104 = arith.constant dense<0.000000e+00> : vector<2x128xf32>
    %211 = tpu.matmul %210, %10, %cst_104 {dimension_numbers = #tpu.dot_dimension_numbers<[1], [0], [0], [1], [0, 0, 1, 1], [], []>} : vector<2x32xf32>, vector<32x128xf32>, vector<2x128xf32> -> vector<2x128xf32>
    %212 = arith.addf %209, %211 : vector<2x128xf32>
    %213 = vector.extract_strided_slice %212 {offsets = [0, 0], sizes = [2, 32], strides = [1, 1]} : vector<2x128xf32> to vector<2x32xf32>
    %214 = arith.negf %213 : vector<2x32xf32>
    %215 = math.exp %214 : vector<2x32xf32>
    %cst_105 = arith.constant 1.000000e+00 : f32
    %216 = vector.broadcast %cst_105 : f32 to vector<2x32xf32>
    %217 = arith.addf %216, %215 : vector<2x32xf32>
    %218 = arith.divf %216, %217 : vector<2x32xf32>
    %219 = vector.extract_strided_slice %212 {offsets = [0, 32], sizes = [2, 32], strides = [1, 1]} : vector<2x128xf32> to vector<2x32xf32>
    %220 = arith.negf %219 : vector<2x32xf32>
    %221 = math.exp %220 : vector<2x32xf32>
    %cst_106 = arith.constant 1.000000e+00 : f32
    %222 = vector.broadcast %cst_106 : f32 to vector<2x32xf32>
    %223 = arith.addf %222, %221 : vector<2x32xf32>
    %224 = arith.divf %222, %223 : vector<2x32xf32>
    %225 = vector.extract_strided_slice %212 {offsets = [0, 64], sizes = [2, 32], strides = [1, 1]} : vector<2x128xf32> to vector<2x32xf32>
    %226 = math.tanh %225 : vector<2x32xf32>
    %227 = vector.extract_strided_slice %212 {offsets = [0, 96], sizes = [2, 32], strides = [1, 1]} : vector<2x128xf32> to vector<2x32xf32>
    %228 = arith.negf %227 : vector<2x32xf32>
    %229 = math.exp %228 : vector<2x32xf32>
    %cst_107 = arith.constant 1.000000e+00 : f32
    %230 = vector.broadcast %cst_107 : f32 to vector<2x32xf32>
    %231 = arith.addf %230, %229 : vector<2x32xf32>
    %232 = arith.divf %230, %231 : vector<2x32xf32>
    %c0_108 = arith.constant 0 : index
    %c0_109 = arith.constant 0 : index
    %233 = vector.load %arg7[%c0_108, %c0_109] : memref<2x32xf32, #tpu.memory_space<vmem>>, vector<2x32xf32>
    %234 = arith.mulf %224, %233 : vector<2x32xf32>
    %235 = arith.mulf %218, %226 : vector<2x32xf32>
    %236 = arith.addf %234, %235 : vector<2x32xf32>
    %237 = math.tanh %236 : vector<2x32xf32>
    %238 = arith.mulf %232, %237 : vector<2x32xf32>
    %c0_110 = arith.constant 0 : index
    %c0_111 = arith.constant 0 : index
    %239 = vector.load %arg7[%c0_110, %c0_111] : memref<2x32xf32, #tpu.memory_space<vmem>>, vector<2x32xf32>
    tpu.vector_store %arg7[%c0_110, %c0_111], %236 {strides = array<i32>} : memref<2x32xf32, #tpu.memory_space<vmem>>, vector<2x32xf32>,
    %c0_112 = arith.constant 0 : index
    %c0_113 = arith.constant 0 : index
    %240 = vector.load %arg6[%c0_112, %c0_113] : memref<2x32xf32, #tpu.memory_space<vmem>>, vector<2x32xf32>
    tpu.vector_store %arg6[%c0_112, %c0_113], %238 {strides = array<i32>} : memref<2x32xf32, #tpu.memory_space<vmem>>, vector<2x32xf32>,
    %c12_114 = arith.constant 12 : index
    %c0_115 = arith.constant 0 : index
    %241 = vector.load %arg5[%c12_114, %c0_115] : memref<24x32xf32, #tpu.memory_space<vmem>>, vector<2x32xf32>
    tpu.vector_store %arg5[%c12_114, %c0_115], %238 {strides = array<i32>} : memref<24x32xf32, #tpu.memory_space<vmem>>, vector<2x32xf32>,
    %c14 = arith.constant 14 : index
    %c0_116 = arith.constant 0 : index
    %242 = vector.load %arg8[%c14, %c0_116] : memref<24x128xf32, #tpu.memory_space<vmem>>, vector<2x128xf32>
    %c0_117 = arith.constant 0 : index
    %c0_118 = arith.constant 0 : index
    %243 = vector.load %arg6[%c0_117, %c0_118] : memref<2x32xf32, #tpu.memory_space<vmem>>, vector<2x32xf32>
    %cst_119 = arith.constant dense<0.000000e+00> : vector<2x128xf32>
    %244 = tpu.matmul %243, %10, %cst_119 {dimension_numbers = #tpu.dot_dimension_numbers<[1], [0], [0], [1], [0, 0, 1, 1], [], []>} : vector<2x32xf32>, vector<32x128xf32>, vector<2x128xf32> -> vector<2x128xf32>
    %245 = arith.addf %242, %244 : vector<2x128xf32>
    %246 = vector.extract_strided_slice %245 {offsets = [0, 0], sizes = [2, 32], strides = [1, 1]} : vector<2x128xf32> to vector<2x32xf32>
    %247 = arith.negf %246 : vector<2x32xf32>
    %248 = math.exp %247 : vector<2x32xf32>
    %cst_120 = arith.constant 1.000000e+00 : f32
    %249 = vector.broadcast %cst_120 : f32 to vector<2x32xf32>
    %250 = arith.addf %249, %248 : vector<2x32xf32>
    %251 = arith.divf %249, %250 : vector<2x32xf32>
    %252 = vector.extract_strided_slice %245 {offsets = [0, 32], sizes = [2, 32], strides = [1, 1]} : vector<2x128xf32> to vector<2x32xf32>
    %253 = arith.negf %252 : vector<2x32xf32>
    %254 = math.exp %253 : vector<2x32xf32>
    %cst_121 = arith.constant 1.000000e+00 : f32
    %255 = vector.broadcast %cst_121 : f32 to vector<2x32xf32>
    %256 = arith.addf %255, %254 : vector<2x32xf32>
    %257 = arith.divf %255, %256 : vector<2x32xf32>
    %258 = vector.extract_strided_slice %245 {offsets = [0, 64], sizes = [2, 32], strides = [1, 1]} : vector<2x128xf32> to vector<2x32xf32>
    %259 = math.tanh %258 : vector<2x32xf32>
    %260 = vector.extract_strided_slice %245 {offsets = [0, 96], sizes = [2, 32], strides = [1, 1]} : vector<2x128xf32> to vector<2x32xf32>
    %261 = arith.negf %260 : vector<2x32xf32>
    %262 = math.exp %261 : vector<2x32xf32>
    %cst_122 = arith.constant 1.000000e+00 : f32
    %263 = vector.broadcast %cst_122 : f32 to vector<2x32xf32>
    %264 = arith.addf %263, %262 : vector<2x32xf32>
    %265 = arith.divf %263, %264 : vector<2x32xf32>
    %c0_123 = arith.constant 0 : index
    %c0_124 = arith.constant 0 : index
    %266 = vector.load %arg7[%c0_123, %c0_124] : memref<2x32xf32, #tpu.memory_space<vmem>>, vector<2x32xf32>
    %267 = arith.mulf %257, %266 : vector<2x32xf32>
    %268 = arith.mulf %251, %259 : vector<2x32xf32>
    %269 = arith.addf %267, %268 : vector<2x32xf32>
    %270 = math.tanh %269 : vector<2x32xf32>
    %271 = arith.mulf %265, %270 : vector<2x32xf32>
    %c0_125 = arith.constant 0 : index
    %c0_126 = arith.constant 0 : index
    %272 = vector.load %arg7[%c0_125, %c0_126] : memref<2x32xf32, #tpu.memory_space<vmem>>, vector<2x32xf32>
    tpu.vector_store %arg7[%c0_125, %c0_126], %269 {strides = array<i32>} : memref<2x32xf32, #tpu.memory_space<vmem>>, vector<2x32xf32>,
    %c0_127 = arith.constant 0 : index
    %c0_128 = arith.constant 0 : index
    %273 = vector.load %arg6[%c0_127, %c0_128] : memref<2x32xf32, #tpu.memory_space<vmem>>, vector<2x32xf32>
    tpu.vector_store %arg6[%c0_127, %c0_128], %271 {strides = array<i32>} : memref<2x32xf32, #tpu.memory_space<vmem>>, vector<2x32xf32>,
    %c14_129 = arith.constant 14 : index
    %c0_130 = arith.constant 0 : index
    %274 = vector.load %arg5[%c14_129, %c0_130] : memref<24x32xf32, #tpu.memory_space<vmem>>, vector<2x32xf32>
    tpu.vector_store %arg5[%c14_129, %c0_130], %271 {strides = array<i32>} : memref<24x32xf32, #tpu.memory_space<vmem>>, vector<2x32xf32>,
    %c16 = arith.constant 16 : index
    %c0_131 = arith.constant 0 : index
    %275 = vector.load %arg8[%c16, %c0_131] : memref<24x128xf32, #tpu.memory_space<vmem>>, vector<2x128xf32>
    %c0_132 = arith.constant 0 : index
    %c0_133 = arith.constant 0 : index
    %276 = vector.load %arg6[%c0_132, %c0_133] : memref<2x32xf32, #tpu.memory_space<vmem>>, vector<2x32xf32>
    %cst_134 = arith.constant dense<0.000000e+00> : vector<2x128xf32>
    %277 = tpu.matmul %276, %10, %cst_134 {dimension_numbers = #tpu.dot_dimension_numbers<[1], [0], [0], [1], [0, 0, 1, 1], [], []>} : vector<2x32xf32>, vector<32x128xf32>, vector<2x128xf32> -> vector<2x128xf32>
    %278 = arith.addf %275, %277 : vector<2x128xf32>
    %279 = vector.extract_strided_slice %278 {offsets = [0, 0], sizes = [2, 32], strides = [1, 1]} : vector<2x128xf32> to vector<2x32xf32>
    %280 = arith.negf %279 : vector<2x32xf32>
    %281 = math.exp %280 : vector<2x32xf32>
    %cst_135 = arith.constant 1.000000e+00 : f32
    %282 = vector.broadcast %cst_135 : f32 to vector<2x32xf32>
    %283 = arith.addf %282, %281 : vector<2x32xf32>
    %284 = arith.divf %282, %283 : vector<2x32xf32>
    %285 = vector.extract_strided_slice %278 {offsets = [0, 32], sizes = [2, 32], strides = [1, 1]} : vector<2x128xf32> to vector<2x32xf32>
    %286 = arith.negf %285 : vector<2x32xf32>
    %287 = math.exp %286 : vector<2x32xf32>
    %cst_136 = arith.constant 1.000000e+00 : f32
    %288 = vector.broadcast %cst_136 : f32 to vector<2x32xf32>
    %289 = arith.addf %288, %287 : vector<2x32xf32>
    %290 = arith.divf %288, %289 : vector<2x32xf32>
    %291 = vector.extract_strided_slice %278 {offsets = [0, 64], sizes = [2, 32], strides = [1, 1]} : vector<2x128xf32> to vector<2x32xf32>
    %292 = math.tanh %291 : vector<2x32xf32>
    %293 = vector.extract_strided_slice %278 {offsets = [0, 96], sizes = [2, 32], strides = [1, 1]} : vector<2x128xf32> to vector<2x32xf32>
    %294 = arith.negf %293 : vector<2x32xf32>
    %295 = math.exp %294 : vector<2x32xf32>
    %cst_137 = arith.constant 1.000000e+00 : f32
    %296 = vector.broadcast %cst_137 : f32 to vector<2x32xf32>
    %297 = arith.addf %296, %295 : vector<2x32xf32>
    %298 = arith.divf %296, %297 : vector<2x32xf32>
    %c0_138 = arith.constant 0 : index
    %c0_139 = arith.constant 0 : index
    %299 = vector.load %arg7[%c0_138, %c0_139] : memref<2x32xf32, #tpu.memory_space<vmem>>, vector<2x32xf32>
    %300 = arith.mulf %290, %299 : vector<2x32xf32>
    %301 = arith.mulf %284, %292 : vector<2x32xf32>
    %302 = arith.addf %300, %301 : vector<2x32xf32>
    %303 = math.tanh %302 : vector<2x32xf32>
    %304 = arith.mulf %298, %303 : vector<2x32xf32>
    %c0_140 = arith.constant 0 : index
    %c0_141 = arith.constant 0 : index
    %305 = vector.load %arg7[%c0_140, %c0_141] : memref<2x32xf32, #tpu.memory_space<vmem>>, vector<2x32xf32>
    tpu.vector_store %arg7[%c0_140, %c0_141], %302 {strides = array<i32>} : memref<2x32xf32, #tpu.memory_space<vmem>>, vector<2x32xf32>,
    %c0_142 = arith.constant 0 : index
    %c0_143 = arith.constant 0 : index
    %306 = vector.load %arg6[%c0_142, %c0_143] : memref<2x32xf32, #tpu.memory_space<vmem>>, vector<2x32xf32>
    tpu.vector_store %arg6[%c0_142, %c0_143], %304 {strides = array<i32>} : memref<2x32xf32, #tpu.memory_space<vmem>>, vector<2x32xf32>,
    %c16_144 = arith.constant 16 : index
    %c0_145 = arith.constant 0 : index
    %307 = vector.load %arg5[%c16_144, %c0_145] : memref<24x32xf32, #tpu.memory_space<vmem>>, vector<2x32xf32>
    tpu.vector_store %arg5[%c16_144, %c0_145], %304 {strides = array<i32>} : memref<24x32xf32, #tpu.memory_space<vmem>>, vector<2x32xf32>,
    %c18 = arith.constant 18 : index
    %c0_146 = arith.constant 0 : index
    %308 = vector.load %arg8[%c18, %c0_146] : memref<24x128xf32, #tpu.memory_space<vmem>>, vector<2x128xf32>
    %c0_147 = arith.constant 0 : index
    %c0_148 = arith.constant 0 : index
    %309 = vector.load %arg6[%c0_147, %c0_148] : memref<2x32xf32, #tpu.memory_space<vmem>>, vector<2x32xf32>
    %cst_149 = arith.constant dense<0.000000e+00> : vector<2x128xf32>
    %310 = tpu.matmul %309, %10, %cst_149 {dimension_numbers = #tpu.dot_dimension_numbers<[1], [0], [0], [1], [0, 0, 1, 1], [], []>} : vector<2x32xf32>, vector<32x128xf32>, vector<2x128xf32> -> vector<2x128xf32>
    %311 = arith.addf %308, %310 : vector<2x128xf32>
    %312 = vector.extract_strided_slice %311 {offsets = [0, 0], sizes = [2, 32], strides = [1, 1]} : vector<2x128xf32> to vector<2x32xf32>
    %313 = arith.negf %312 : vector<2x32xf32>
    %314 = math.exp %313 : vector<2x32xf32>
    %cst_150 = arith.constant 1.000000e+00 : f32
    %315 = vector.broadcast %cst_150 : f32 to vector<2x32xf32>
    %316 = arith.addf %315, %314 : vector<2x32xf32>
    %317 = arith.divf %315, %316 : vector<2x32xf32>
    %318 = vector.extract_strided_slice %311 {offsets = [0, 32], sizes = [2, 32], strides = [1, 1]} : vector<2x128xf32> to vector<2x32xf32>
    %319 = arith.negf %318 : vector<2x32xf32>
    %320 = math.exp %319 : vector<2x32xf32>
    %cst_151 = arith.constant 1.000000e+00 : f32
    %321 = vector.broadcast %cst_151 : f32 to vector<2x32xf32>
    %322 = arith.addf %321, %320 : vector<2x32xf32>
    %323 = arith.divf %321, %322 : vector<2x32xf32>
    %324 = vector.extract_strided_slice %311 {offsets = [0, 64], sizes = [2, 32], strides = [1, 1]} : vector<2x128xf32> to vector<2x32xf32>
    %325 = math.tanh %324 : vector<2x32xf32>
    %326 = vector.extract_strided_slice %311 {offsets = [0, 96], sizes = [2, 32], strides = [1, 1]} : vector<2x128xf32> to vector<2x32xf32>
    %327 = arith.negf %326 : vector<2x32xf32>
    %328 = math.exp %327 : vector<2x32xf32>
    %cst_152 = arith.constant 1.000000e+00 : f32
    %329 = vector.broadcast %cst_152 : f32 to vector<2x32xf32>
    %330 = arith.addf %329, %328 : vector<2x32xf32>
    %331 = arith.divf %329, %330 : vector<2x32xf32>
    %c0_153 = arith.constant 0 : index
    %c0_154 = arith.constant 0 : index
    %332 = vector.load %arg7[%c0_153, %c0_154] : memref<2x32xf32, #tpu.memory_space<vmem>>, vector<2x32xf32>
    %333 = arith.mulf %323, %332 : vector<2x32xf32>
    %334 = arith.mulf %317, %325 : vector<2x32xf32>
    %335 = arith.addf %333, %334 : vector<2x32xf32>
    %336 = math.tanh %335 : vector<2x32xf32>
    %337 = arith.mulf %331, %336 : vector<2x32xf32>
    %c0_155 = arith.constant 0 : index
    %c0_156 = arith.constant 0 : index
    %338 = vector.load %arg7[%c0_155, %c0_156] : memref<2x32xf32, #tpu.memory_space<vmem>>, vector<2x32xf32>
    tpu.vector_store %arg7[%c0_155, %c0_156], %335 {strides = array<i32>} : memref<2x32xf32, #tpu.memory_space<vmem>>, vector<2x32xf32>,
    %c0_157 = arith.constant 0 : index
    %c0_158 = arith.constant 0 : index
    %339 = vector.load %arg6[%c0_157, %c0_158] : memref<2x32xf32, #tpu.memory_space<vmem>>, vector<2x32xf32>
    tpu.vector_store %arg6[%c0_157, %c0_158], %337 {strides = array<i32>} : memref<2x32xf32, #tpu.memory_space<vmem>>, vector<2x32xf32>,
    %c18_159 = arith.constant 18 : index
    %c0_160 = arith.constant 0 : index
    %340 = vector.load %arg5[%c18_159, %c0_160] : memref<24x32xf32, #tpu.memory_space<vmem>>, vector<2x32xf32>
    tpu.vector_store %arg5[%c18_159, %c0_160], %337 {strides = array<i32>} : memref<24x32xf32, #tpu.memory_space<vmem>>, vector<2x32xf32>,
    %c20 = arith.constant 20 : index
    %c0_161 = arith.constant 0 : index
    %341 = vector.load %arg8[%c20, %c0_161] : memref<24x128xf32, #tpu.memory_space<vmem>>, vector<2x128xf32>
    %c0_162 = arith.constant 0 : index
    %c0_163 = arith.constant 0 : index
    %342 = vector.load %arg6[%c0_162, %c0_163] : memref<2x32xf32, #tpu.memory_space<vmem>>, vector<2x32xf32>
    %cst_164 = arith.constant dense<0.000000e+00> : vector<2x128xf32>
    %343 = tpu.matmul %342, %10, %cst_164 {dimension_numbers = #tpu.dot_dimension_numbers<[1], [0], [0], [1], [0, 0, 1, 1], [], []>} : vector<2x32xf32>, vector<32x128xf32>, vector<2x128xf32> -> vector<2x128xf32>
    %344 = arith.addf %341, %343 : vector<2x128xf32>
    %345 = vector.extract_strided_slice %344 {offsets = [0, 0], sizes = [2, 32], strides = [1, 1]} : vector<2x128xf32> to vector<2x32xf32>
    %346 = arith.negf %345 : vector<2x32xf32>
    %347 = math.exp %346 : vector<2x32xf32>
    %cst_165 = arith.constant 1.000000e+00 : f32
    %348 = vector.broadcast %cst_165 : f32 to vector<2x32xf32>
    %349 = arith.addf %348, %347 : vector<2x32xf32>
    %350 = arith.divf %348, %349 : vector<2x32xf32>
    %351 = vector.extract_strided_slice %344 {offsets = [0, 32], sizes = [2, 32], strides = [1, 1]} : vector<2x128xf32> to vector<2x32xf32>
    %352 = arith.negf %351 : vector<2x32xf32>
    %353 = math.exp %352 : vector<2x32xf32>
    %cst_166 = arith.constant 1.000000e+00 : f32
    %354 = vector.broadcast %cst_166 : f32 to vector<2x32xf32>
    %355 = arith.addf %354, %353 : vector<2x32xf32>
    %356 = arith.divf %354, %355 : vector<2x32xf32>
    %357 = vector.extract_strided_slice %344 {offsets = [0, 64], sizes = [2, 32], strides = [1, 1]} : vector<2x128xf32> to vector<2x32xf32>
    %358 = math.tanh %357 : vector<2x32xf32>
    %359 = vector.extract_strided_slice %344 {offsets = [0, 96], sizes = [2, 32], strides = [1, 1]} : vector<2x128xf32> to vector<2x32xf32>
    %360 = arith.negf %359 : vector<2x32xf32>
    %361 = math.exp %360 : vector<2x32xf32>
    %cst_167 = arith.constant 1.000000e+00 : f32
    %362 = vector.broadcast %cst_167 : f32 to vector<2x32xf32>
    %363 = arith.addf %362, %361 : vector<2x32xf32>
    %364 = arith.divf %362, %363 : vector<2x32xf32>
    %c0_168 = arith.constant 0 : index
    %c0_169 = arith.constant 0 : index
    %365 = vector.load %arg7[%c0_168, %c0_169] : memref<2x32xf32, #tpu.memory_space<vmem>>, vector<2x32xf32>
    %366 = arith.mulf %356, %365 : vector<2x32xf32>
    %367 = arith.mulf %350, %358 : vector<2x32xf32>
    %368 = arith.addf %366, %367 : vector<2x32xf32>
    %369 = math.tanh %368 : vector<2x32xf32>
    %370 = arith.mulf %364, %369 : vector<2x32xf32>
    %c0_170 = arith.constant 0 : index
    %c0_171 = arith.constant 0 : index
    %371 = vector.load %arg7[%c0_170, %c0_171] : memref<2x32xf32, #tpu.memory_space<vmem>>, vector<2x32xf32>
    tpu.vector_store %arg7[%c0_170, %c0_171], %368 {strides = array<i32>} : memref<2x32xf32, #tpu.memory_space<vmem>>, vector<2x32xf32>,
    %c0_172 = arith.constant 0 : index
    %c0_173 = arith.constant 0 : index
    %372 = vector.load %arg6[%c0_172, %c0_173] : memref<2x32xf32, #tpu.memory_space<vmem>>, vector<2x32xf32>
    tpu.vector_store %arg6[%c0_172, %c0_173], %370 {strides = array<i32>} : memref<2x32xf32, #tpu.memory_space<vmem>>, vector<2x32xf32>,
    %c20_174 = arith.constant 20 : index
    %c0_175 = arith.constant 0 : index
    %373 = vector.load %arg5[%c20_174, %c0_175] : memref<24x32xf32, #tpu.memory_space<vmem>>, vector<2x32xf32>
    tpu.vector_store %arg5[%c20_174, %c0_175], %370 {strides = array<i32>} : memref<24x32xf32, #tpu.memory_space<vmem>>, vector<2x32xf32>,
    %c22 = arith.constant 22 : index
    %c0_176 = arith.constant 0 : index
    %374 = vector.load %arg8[%c22, %c0_176] : memref<24x128xf32, #tpu.memory_space<vmem>>, vector<2x128xf32>
    %c0_177 = arith.constant 0 : index
    %c0_178 = arith.constant 0 : index
    %375 = vector.load %arg6[%c0_177, %c0_178] : memref<2x32xf32, #tpu.memory_space<vmem>>, vector<2x32xf32>
    %cst_179 = arith.constant dense<0.000000e+00> : vector<2x128xf32>
    %376 = tpu.matmul %375, %10, %cst_179 {dimension_numbers = #tpu.dot_dimension_numbers<[1], [0], [0], [1], [0, 0, 1, 1], [], []>} : vector<2x32xf32>, vector<32x128xf32>, vector<2x128xf32> -> vector<2x128xf32>
    %377 = arith.addf %374, %376 : vector<2x128xf32>
    %378 = vector.extract_strided_slice %377 {offsets = [0, 0], sizes = [2, 32], strides = [1, 1]} : vector<2x128xf32> to vector<2x32xf32>
    %379 = arith.negf %378 : vector<2x32xf32>
    %380 = math.exp %379 : vector<2x32xf32>
    %cst_180 = arith.constant 1.000000e+00 : f32
    %381 = vector.broadcast %cst_180 : f32 to vector<2x32xf32>
    %382 = arith.addf %381, %380 : vector<2x32xf32>
    %383 = arith.divf %381, %382 : vector<2x32xf32>
    %384 = vector.extract_strided_slice %377 {offsets = [0, 32], sizes = [2, 32], strides = [1, 1]} : vector<2x128xf32> to vector<2x32xf32>
    %385 = arith.negf %384 : vector<2x32xf32>
    %386 = math.exp %385 : vector<2x32xf32>
    %cst_181 = arith.constant 1.000000e+00 : f32
    %387 = vector.broadcast %cst_181 : f32 to vector<2x32xf32>
    %388 = arith.addf %387, %386 : vector<2x32xf32>
    %389 = arith.divf %387, %388 : vector<2x32xf32>
    %390 = vector.extract_strided_slice %377 {offsets = [0, 64], sizes = [2, 32], strides = [1, 1]} : vector<2x128xf32> to vector<2x32xf32>
    %391 = math.tanh %390 : vector<2x32xf32>
    %392 = vector.extract_strided_slice %377 {offsets = [0, 96], sizes = [2, 32], strides = [1, 1]} : vector<2x128xf32> to vector<2x32xf32>
    %393 = arith.negf %392 : vector<2x32xf32>
    %394 = math.exp %393 : vector<2x32xf32>
    %cst_182 = arith.constant 1.000000e+00 : f32
    %395 = vector.broadcast %cst_182 : f32 to vector<2x32xf32>
    %396 = arith.addf %395, %394 : vector<2x32xf32>
    %397 = arith.divf %395, %396 : vector<2x32xf32>
    %c0_183 = arith.constant 0 : index
    %c0_184 = arith.constant 0 : index
    %398 = vector.load %arg7[%c0_183, %c0_184] : memref<2x32xf32, #tpu.memory_space<vmem>>, vector<2x32xf32>
    %399 = arith.mulf %389, %398 : vector<2x32xf32>
    %400 = arith.mulf %383, %391 : vector<2x32xf32>
    %401 = arith.addf %399, %400 : vector<2x32xf32>
    %402 = math.tanh %401 : vector<2x32xf32>
    %403 = arith.mulf %397, %402 : vector<2x32xf32>
    %c0_185 = arith.constant 0 : index
    %c0_186 = arith.constant 0 : index
    %404 = vector.load %arg7[%c0_185, %c0_186] : memref<2x32xf32, #tpu.memory_space<vmem>>, vector<2x32xf32>
    tpu.vector_store %arg7[%c0_185, %c0_186], %401 {strides = array<i32>} : memref<2x32xf32, #tpu.memory_space<vmem>>, vector<2x32xf32>,
    %c0_187 = arith.constant 0 : index
    %c0_188 = arith.constant 0 : index
    %405 = vector.load %arg6[%c0_187, %c0_188] : memref<2x32xf32, #tpu.memory_space<vmem>>, vector<2x32xf32>
    tpu.vector_store %arg6[%c0_187, %c0_188], %403 {strides = array<i32>} : memref<2x32xf32, #tpu.memory_space<vmem>>, vector<2x32xf32>,
    %c22_189 = arith.constant 22 : index
    %c0_190 = arith.constant 0 : index
    %406 = vector.load %arg5[%c22_189, %c0_190] : memref<24x32xf32, #tpu.memory_space<vmem>>, vector<2x32xf32>
    tpu.vector_store %arg5[%c22_189, %c0_190], %403 {strides = array<i32>} : memref<24x32xf32, #tpu.memory_space<vmem>>, vector<2x32xf32>,
    return
  }
  func.func @transform_0(%arg0: i32) -> (i32, i32) {
    %c0_i32 = arith.constant 0 : i32
    %c0_i32_0 = arith.constant 0 : i32
    return %arg0, %c0_i32 : i32, i32
  }
  func.func @transform_1(%arg0: i32) -> (i32, i32) {
    %c0_i32 = arith.constant 0 : i32
    %c0_i32_0 = arith.constant 0 : i32
    %c0_i32_1 = arith.constant 0 : i32
    return %c0_i32, %c0_i32_0 : i32, i32
  }
  func.func @transform_2(%arg0: i32) -> (i32, i32) {
    %c0_i32 = arith.constant 0 : i32
    %c0_i32_0 = arith.constant 0 : i32
    %c0_i32_1 = arith.constant 0 : i32
    return %c0_i32, %c0_i32_0 : i32, i32
  }
  func.func @transform_3(%arg0: i32) -> (i32, i32) {
    %c0_i32 = arith.constant 0 : i32
    %c0_i32_0 = arith.constant 0 : i32
    %c0_i32_1 = arith.constant 0 : i32
    return %c0_i32, %c0_i32_0 : i32, i32
  }
  func.func @transform_4(%arg0: i32) -> (i32, i32) {
    %c0_i32 = arith.constant 0 : i32
    %c0_i32_0 = arith.constant 0 : i32
    return %arg0, %c0_i32 : i32, i32
  }
}

</mosaic_0001>

<bundles_post_ra>
// kernel: tpu_custom_call.1
= control target key start
LH: loop header
LB: loop body
LE: loop exit
PB: predicated region body
PF: predicated region fallthrough
CT: control target
= control target key end

     0   :  { %9 = vsyncpa [#allocation6], 0  ;;  %s2435_s0 = inlined_call_operand.hbm [shape: f32[24,32], index: 0, kind: input, shape index: {}]   ;;  %s2436_s1 = inlined_call_operand.hbm [shape: f32[32,128], index: 1, kind: input, shape index: {}]   ;;  %s2437_s2 = inlined_call_operand.vmem [shape: f32[1,128], index: 2, kind: input, shape index: {}]   ;;  %s2438_s3 = inlined_call_operand.hbm [shape: f32[32,128], index: 3, kind: input, shape index: {}]   ;;  %s2439_s4 = inlined_call_operand.hbm [shape: f32[24,32], index: 4, kind: output, shape index: {}]  }
   0x1   :  { %10 = vsyncpa [#allocation9], 0 }
   0x2   :  { %11 = vsyncpa [#allocation7], 0  ;;  %s2112_s15 = smov [#allocation8]   ;;  %s2113_s17 = smov [#allocation5]  }
   0x3   :  { %s29_s16 = sshll.u32 %s2112_s15, 4  ;;  %s17_s18 = sshll.u32 %s2113_s17, 4  ;;  %s30_s16 = int_to_ptr.vmem [resolvable:$true] %s29_s16  ;;  %s2149_s18 = int_to_ptr.vmem [resolvable:$true] %s17_s18 }
   0x4   :  { %s2018_s21 = scalar_lea.hbm %s2436_s1, 512 }
   0x5   :  { %p2019_p0 = scmp.ne.s32.totalorder %s2436_s1, %s2018_s21  ;;  %p2022_p1 = scmp.lt.u32.totalorder %s2018_s21, %s2436_s1 }
   0x7   :  { %p2024_p2 = pnand %p2022_p1, %p2019_p0 }
   0x9   :  { %2027 = shalt.err (!%p2024_p2)
}
   0xa   :  { %s2028_s26 = scalar_lea.vmem %s30_s16, 512  ;;  %p2033_p4 = scmp.lt.s32.totalorder %s30_s16, %s30_s16 }
   0xb   :  { %p2029_p3 = scmp.ne.s32.totalorder %s30_s16, %s2028_s26  ;;  %p2034_p5 = scmp.lt.s32.totalorder %s2028_s26, %s2028_s26 }
   0xd   :  { %p2035_p6 = por %p2034_p5, %p2033_p4 }
   0xf   :  { %p2036_p7 = pnand %p2035_p6, %p2029_p3 }
  0x11   :  { %2039 = shalt.err (!%p2036_p7)
}
  0x12   :  { %s2114_s27 = smov 128   ;;  %s2115_s28 = smov 8  }
  0x13   :  { %35 = dma.hbm_to_vmem [thread:$0]  %s2436_s1, 512, %s30_s16, [#allocation9], %s2114_s27, %s2114_s27, %s2115_s28  }
  0x14   :  { %s2040_s7 = scalar_lea.hbm %s2435_s0, 384 }
  0x15   :  { %p2041_p8 = scmp.ne.s32.totalorder %s2435_s0, %s2040_s7  ;;  %p2044_p9 = scmp.lt.u32.totalorder %s2040_s7, %s2435_s0 }
  0x17   :  { %p2046_p10 = pnand %p2044_p9, %p2041_p8 }
  0x19   :  { %2049 = shalt.err (!%p2046_p10)
}
  0x1a   :  { %s2050_s12 = scalar_lea.vmem %s2149_s18, 384  ;;  %p2055_p12 = scmp.lt.s32.totalorder %s2149_s18, %s2149_s18 }
  0x1b   :  { %p2051_p11 = scmp.ne.s32.totalorder %s2149_s18, %s2050_s12  ;;  %p2056_p13 = scmp.lt.s32.totalorder %s2050_s12, %s2050_s12 }
  0x1d   :  { %p2057_p0 = por %p2056_p13, %p2055_p12 }
  0x1f   :  { %p2058_p1 = pnand %p2057_p0, %p2051_p11 }
  0x21   :  { %2061 = shalt.err (!%p2058_p1)
}
  0x22   :  { %23 = dma.hbm_to_vmem [thread:$0]  %s2435_s0, 384, %s2149_s18, [#allocation6], %s2114_s27, %s2114_s27, %s2115_s28  }
  0x23   :  { %s2116_s14 = smov [#allocation10]   ;;  %s2062_s19 = scalar_lea.hbm %s2438_s3, 512 }
  0x24   :  { %s43_s15 = sshll.u32 %s2116_s14, 4  ;;  %p2063_p2 = scmp.ne.s32.totalorder %s2438_s3, %s2062_s19  ;;  %s44_s15 = int_to_ptr.vmem [resolvable:$true] %s43_s15 }
  0x25   :  { %p2066_p3 = scmp.lt.u32.totalorder %s2062_s19, %s2438_s3 }
  0x27   :  { %p2068_p4 = pnand %p2066_p3, %p2063_p2 }
  0x29   :  { %2071 = shalt.err (!%p2068_p4)
}
  0x2a   :  { %s2072_s24 = scalar_lea.vmem %s44_s15, 512  ;;  %p2077_p6 = scmp.lt.s32.totalorder %s44_s15, %s44_s15 }
  0x2b   :  { %p2073_p5 = scmp.ne.s32.totalorder %s44_s15, %s2072_s24  ;;  %p2078_p7 = scmp.lt.s32.totalorder %s2072_s24, %s2072_s24 }
  0x2d   :  { %p2079_p8 = por %p2078_p7, %p2077_p6 }
  0x2f   :  { %p2080_p9 = pnand %p2079_p8, %p2073_p5 }
  0x31   :  { %2083 = shalt.err (!%p2080_p9)
}
  0x32   :  { %49 = dma.hbm_to_vmem [thread:$0]  %s2438_s3, 512, %s44_s15, [#allocation9], %s2114_s27, %s2114_s27, %s2115_s28  }
  0x33   :  { %2106 = dma.done.wait [#allocation6], 384  }
  0x34   :  { %2107 = vsyncadd [#allocation6], 4294966912 }
  0x35   :  { %2108 = dma.done.wait [#allocation9], 1024  }
  0x36   :  { %2109 = vsyncadd [#allocation9], 4294966272  ;;  %v2117_v0 = vmov 0.0|0.0   ;;  %vm2118_vm0 = vmmov 0   ;;  %v2119_v1 = vmov 0.0   ;;  %vm63_vm1 = vcmask 254976  }
  0x37   :  { %1832 = vmatprep.subr.bf16.mxu0 %v2117_v0  ;;  %1691 = vmatprep.mubr.msk.f32.mxu0 %vm2118_vm0, %v2119_v1  ;;  %64 = vst.msk [vmem:[#allocation2] sm:$0x3] %vm63_vm1, %v2119_v1  ;;  %65 = vst.msk [vmem:[#allocation3] sm:$0x3] %vm63_vm1, %v2119_v1  ;;  %v69_v2 = vld [vmem:[#allocation8] sm:$0xff]  ;;  %v70_v3 = vld [vmem:[#allocation8 + $0x8] sm:$0xff] }
  0x38   :  { %1838 = vmatprep.subr.bf16.mxu1 %v2117_v0  ;;  %1708 = vmatprep.mubr.msk.f32.mxu1 %vm2118_vm0, %v2119_v1  ;;  %v71_v4 = vld [vmem:[#allocation8 + $0x10] sm:$0xff]  ;;  %v1833_v5 = vpack.c.bf16 %v70_v3, %v69_v2  ;;  %v72_v6 = vld [vmem:[#allocation8 + $0x18] sm:$0xff]  ;;  %v173_v7 = vld [vmem:[#allocation10] sm:$0xff]  ;;  %vm80_vm2 = vcmask 261120   ;;  %s2120_s26 = smov 64   ;;  %s2121_s29 = smov 32  }
  0x39   :  { %v174_v8 = vld [vmem:[#allocation10 + $0x8] sm:$0xff]  ;;  %v175_v9 = vld [vmem:[#allocation10 + $0x10] sm:$0xff]  ;;  %v176_v10 = vld [vmem:[#allocation10 + $0x18] sm:$0xff]  ;;  %v1836_v11 = vpack.c.bf16 %v72_v6, %v71_v4  ;;  %s2123_s30 = smov [#allocation11]  }
  0x3a   :  { %1834 = vmatpush3.bf16.msra.mxu0 %v1833_v5  ;;  %v2211_v12 = vpack.c.bf16 %v174_v8, %v173_v7  ;;  %v2215_v13 = vpack.c.bf16 %v176_v10, %v175_v9  ;;  %v66_v14 = vld [vmem:[#allocation5] sm:$0xff]  ;;  %v67_v59 = vld [vmem:[#allocation5 + $0x8] sm:$0xff]  ;;  %v68_v60 = vld [vmem:[#allocation5 + $0x10] sm:$0xff]  ;;  %s1575_s5 = sshll.u32 %s2123_s30, 4  ;;  %s1576_s5 = int_to_ptr.vmem [resolvable:$true] %s1575_s5 }
  0x3b   :  { %1835 = vmatprep.subr.bf16.mxu0 %v2117_v0  ;;  %v2238_v16 = vld [vmem:[%s2437_s2] ss:$0 sm:$0xff]  ;;  %s2122_s2 = smov 96   ;;  %s2084_s6 = scalar_lea.vmem %s1576_s5, 384 }
  0x3c   :  { %1840 = vmatpush3.bf16.msra.mxu1 %v2211_v12  ;;  %p2085_p10 = scmp.ne.s32.totalorder %s1576_s5, %s2084_s6  ;;  %p2089_p11 = scmp.lt.s32.totalorder %s1576_s5, %s1576_s5 }
  0x3d   :  { %1841 = vmatprep.subr.bf16.mxu1 %v2117_v0  ;;  %p2090_p12 = scmp.lt.s32.totalorder %s2084_s6, %s2084_s6 }
  0x3e   :  { %1837 = vmatpush3.bf16.msra.mxu0 %v1836_v11  ;;  %v178_v15 = vld [vmem:[#allocation2] sm:$0x3]  ;;  %v260_v25 = vld [vmem:[#allocation3] sm:$0x3] }
  0x3f   :  { %1850 = vmatprep.subr.bf16.mxu0 %v2117_v0  ;;  %p2091_p13 = por %p2090_p12, %p2089_p11 }
  0x40   :  { %1843 = vmatpush3.bf16.msra.mxu1 %v2215_v13 }
  0x41   :  { %1692 = vmatmul.mubr.msk.f32.vlgmr.msra.gmra.mrb[0].mxu0 %vm80_vm2, %v66_v14  ;;  %1844 = vmatprep.subr.bf16.mxu1 %v2117_v0  ;;  %p2092_p0 = pnand %p2091_p13, %p2085_p10 }
  0x42   :  { %1852 = vmatpush3.bf16.msra.mxu0 %v2211_v12  ;;  %1694 = vmatprep.mubr.msk.f32.mxu0 %vm2118_vm0, %v2119_v1 }
  0x43   :  { %1709 = vmatmul.mubr.msk.f32.vlgmr.msra.gmra.mrb[0].mxu1 %vm80_vm2, %v178_v15  ;;  %1853 = vmatprep.subr.bf16.mxu0 %v2117_v0 }
  0x44   :  { %1846 = vmatpush3.bf16.msra.mxu1 %v2211_v12  ;;  %1719 = vmatprep.mubr.msk.f32.mxu1 %vm2118_vm0, %v2119_v1 }
  0x45   :  { %1847 = vmatprep.subr.bf16.mxu1 %v2117_v0  ;;  %1695 = vmatmul.mubr.msk.f32.gmra.mrb[2].mxu0 %vm80_vm2, %v67_v59 }
  0x46   :  { %1855 = vmatpush3.bf16.msra.mxu0 %v2215_v13  ;;  %1697 = vmatprep.mubr.msk.f32.mxu0 %vm2118_vm0, %v2119_v1 }
  0x47   :  { %1862 = vmatprep.subr.bf16.mxu0 %v2117_v0 }
  0x48   :  { %1849 = vmatpush3.bf16.msra.mxu1 %v2215_v13 }
  0x49   :  { %1856 = vmatprep.subr.bf16.mxu1 %v2117_v0  ;;  %1698 = vmatmul.mubr.msk.f32.gmra.mrb[4].mxu0 %vm80_vm2, %v68_v60 }
  0x4a   :  { %1730 = vmatprep.mubr.msk.f32.mxu0 %vm2118_vm0, %v2119_v1 }
 0x114   :  { %v156_v17 = vpop.f32.mrb[0].mxu0 }
 0x115   :  { %v157_v18 = vadd.f32 %v2238_v16, %v156_v17  ;;  %v1693_v19 = vpop.f32.mrb[1].mxu0 }
 0x116   :  { %v248_v20 = vpop.f32.mrb[0].mxu1 }
 0x117   :  { %170 = vst [vmem:[#allocation4] sm:$0xff] %v157_v18  ;;  %v1710_v21 = vpop.f32.mrb[1].mxu1 }
 0x118   :  { %v161_v3 = vpop.f32.mrb[2].mxu0 }
 0x119   :  { %v162_v4 = vadd.f32 %v2238_v16, %v161_v3  ;;  %v1696_v5 = vpop.f32.mrb[3].mxu0 }
 0x11b   :  { %171 = vst [vmem:[#allocation4 + $0x8] sm:$0xff] %v162_v4 }
 0x11c   :  { %v166_v8 = vpop.f32.mrb[4].mxu0 }
 0x11d   :  { %v167_v9 = vadd.f32 %v2238_v16, %v166_v8  ;;  %v1699_v10 = vpop.f32.mrb[5].mxu0 }
 0x11e   :  { %v177_v22 = vld [vmem:[#allocation4] sm:$0x3]  ;;  %v294_v43 = vld [vmem:[#allocation4 + $0x2] sm:$0x3]  ;;  %v410_v11 = vld [vmem:[#allocation4 + $0x4] sm:$0x3] }
 0x11f   :  { %v252_v23 = vadd.f32 %v248_v20, %v177_v22  ;;  %172 = vst [vmem:[#allocation4 + $0x10] sm:$0xff] %v167_v9 }
 0x121   :  { %1922 = vtanh.f32 %v252_v23  ;;  %v1593_v26 = vmul.f32 -1.442695, %v252_v23 }
 0x123   :  { %1924 = vpow2.f32 %v1593_v26 }
 0x12b   :  { %v1923_v24 = vpop.eup %1922 }
 0x12c   :  { %267 = vrot.lane.b32.xlu0 %v1923_v24, %s2120_s26 }
 0x12d   :  { %v1925_v27 = vpop.eup %1924 }
 0x12e   :  { %v256_v28 = vadd.f32 1.0, %v1925_v27 }
 0x130   :  { %262 = vrot.lane.b32.xlu0 %v260_v25, %s2121_s29  ;;  %1926 = vrcp.f32 %v256_v28 }
 0x13a   :  { %v1927_v29 = vpop.eup %1926 }
 0x19e   :  { %v268_v30 = vpop.permute.xlu0 %267 }
 0x19f   :  { %v270_v31 = vmul.f32 %v1927_v29, %v268_v30 }
 0x1a1   :  { %272 = vrot.lane.b32.xlu1 %v270_v31, %s2121_s29 }
 0x1a2   :  { %v263_v32 = vpop.permute.xlu0 %262 }
 0x1a3   :  { %v265_v33 = vmul.f32 %v1927_v29, %v263_v32 }
 0x213   :  { %v273_v34 = vpop.permute.xlu1 %272 }
 0x214   :  { %v275_v35 = vadd.f32 %v273_v34, %v265_v33 }
 0x216   :  { %1928 = vtanh.f32 %v275_v35 }
 0x220   :  { %v1929_v36 = vpop.eup %1928 }
 0x221   :  { %278 = vrot.lane.b32.xlu1 %v1929_v36, %s2120_s26 }
 0x225   :  { %283 = vrot.lane.b32.xlu1 %v275_v35, %s2122_s2  ;;  %v526_v35 = vld [vmem:[#allocation4 + $0x6] sm:$0x3] }
 0x293   :  { %v279_v37 = vpop.permute.xlu1 %278 }
 0x294   :  { %v281_v38 = vmul.f32 %v1927_v29, %v279_v37 }
 0x296   :  { %289 = vrot.lane.b32.xlu0 %v281_v38, %s2121_s29 }
 0x297   :  { %v284_v39 = vpop.permute.xlu1 %283 }
 0x298   :  { %287 = vst.msk [vmem:[#allocation3] sm:$0x3] %vm63_vm1, %v284_v39 }
 0x29f   :  { %v377_v40 = vld [vmem:[#allocation3] sm:$0x3] }
 0x2a0   :  { %379 = vrot.lane.b32.xlu1 %v377_v40, %s2121_s29 }
 0x308   :  { %v290_v41 = vpop.permute.xlu0 %289 }
 0x309   :  { %292 = vst.msk [vmem:[#allocation2] sm:$0x3] %vm63_vm1, %v290_v41  ;;  %293 = vst.msk [vmem:[#allocation11] sm:$0x3] %vm63_vm1, %v290_v41 }
 0x310   :  { %v295_v42 = vld [vmem:[#allocation2] sm:$0x3] }
 0x311   :  { %1720 = vmatmul.mubr.msk.f32.vlgmr.msra.gmra.mrb[2].mxu1 %vm80_vm2, %v295_v42 }
 0x312   :  { %1858 = vmatpush3.bf16.msra.mxu1 %v2211_v12  ;;  %1741 = vmatprep.mubr.msk.f32.mxu1 %vm2118_vm0, %v2119_v1  ;;  %v380_v54 = vpop.permute.xlu1 %379 }
 0x313   :  { %1859 = vmatprep.subr.bf16.mxu1 %v2117_v0 }
 0x316   :  { %1861 = vmatpush3.bf16.msra.mxu1 %v2215_v13 }
 0x317   :  { %1868 = vmatprep.subr.bf16.mxu1 %v2117_v0 }
 0x3e4   :  { %v365_v44 = vpop.f32.mrb[2].mxu1 }
 0x3e5   :  { %v369_v45 = vadd.f32 %v365_v44, %v294_v43  ;;  %v1721_v46 = vpop.f32.mrb[3].mxu1 }
 0x3e7   :  { %1930 = vtanh.f32 %v369_v45  ;;  %v1595_v48 = vmul.f32 -1.442695, %v369_v45 }
 0x3e9   :  { %1932 = vpow2.f32 %v1595_v48 }
 0x3f1   :  { %v1931_v47 = vpop.eup %1930 }
 0x3f2   :  { %384 = vrot.lane.b32.xlu0 %v1931_v47, %s2120_s26 }
 0x3f3   :  { %v1933_v49 = vpop.eup %1932 }
 0x3f4   :  { %v373_v50 = vadd.f32 1.0, %v1933_v49 }
 0x3f6   :  { %1934 = vrcp.f32 %v373_v50 }
 0x400   :  { %v1935_v51 = vpop.eup %1934 }
 0x401   :  { %v382_v55 = vmul.f32 %v1935_v51, %v380_v54 }
 0x464   :  { %v385_v52 = vpop.permute.xlu0 %384 }
 0x465   :  { %v387_v53 = vmul.f32 %v1935_v51, %v385_v52 }
 0x467   :  { %389 = vrot.lane.b32.xlu0 %v387_v53, %s2121_s29 }
 0x4d9   :  { %v390_v56 = vpop.permute.xlu0 %389 }
 0x4da   :  { %v392_v57 = vadd.f32 %v390_v56, %v382_v55 }
 0x4dc   :  { %1936 = vtanh.f32 %v392_v57 }
 0x4e6   :  { %v1937_v58 = vpop.eup %1936 }
 0x4e7   :  { %395 = vrot.lane.b32.xlu1 %v1937_v58, %s2120_s26 }
 0x4eb   :  { %400 = vrot.lane.b32.xlu1 %v392_v57, %s2122_s2  ;;  %v642_v57 = vld [vmem:[#allocation4 + $0x8] sm:$0x3] }
 0x559   :  { %v396_v61 = vpop.permute.xlu1 %395 }
 0x55a   :  { %v398_v62 = vmul.f32 %v1935_v51, %v396_v61 }
 0x55c   :  { %405 = vrot.lane.b32.xlu0 %v398_v62, %s2121_s29 }
 0x55d   :  { %v401_v63 = vpop.permute.xlu1 %400 }
 0x55e   :  { %403 = vst.msk [vmem:[#allocation3] sm:$0x3] %vm63_vm1, %v401_v63 }
 0x565   :  { %v493_v2 = vld [vmem:[#allocation3] sm:$0x3] }
 0x566   :  { %495 = vrot.lane.b32.xlu1 %v493_v2, %s2121_s29 }
 0x5ce   :  { %v406_v6 = vpop.permute.xlu0 %405 }
 0x5cf   :  { %408 = vst.msk [vmem:[#allocation2] sm:$0x3] %vm63_vm1, %v406_v6  ;;  %409 = vst.msk [vmem:[#allocation11 + $0x2] sm:$0x3] %vm63_vm1, %v406_v6 }
 0x5d6   :  { %v411_v7 = vld [vmem:[#allocation2] sm:$0x3] }
 0x5d7   :  { %1731 = vmatmul.mubr.msk.f32.vlgmr.msra.gmra.mrb[6].mxu0 %vm80_vm2, %v411_v7 }
 0x5d8   :  { %1864 = vmatpush3.bf16.msra.mxu0 %v2211_v12  ;;  %1752 = vmatprep.mubr.msk.f32.mxu0 %vm2118_vm0, %v2119_v1  ;;  %v496_v16 = vpop.permute.xlu1 %495 }
 0x5d9   :  { %1865 = vmatprep.subr.bf16.mxu0 %v2117_v0 }
 0x5dc   :  { %1867 = vmatpush3.bf16.msra.mxu0 %v2215_v13 }
 0x5dd   :  { %1874 = vmatprep.subr.bf16.mxu0 %v2117_v0 }
 0x6aa   :  { %v481_v14 = vpop.f32.mrb[6].mxu0 }
 0x6ab   :  { %v485_v15 = vadd.f32 %v481_v14, %v410_v11  ;;  %v1732_v17 = vpop.f32.mrb[7].mxu0 }
 0x6ad   :  { %1938 = vtanh.f32 %v485_v15  ;;  %v1597_v19 = vmul.f32 -1.442695, %v485_v15 }
 0x6af   :  { %1940 = vpow2.f32 %v1597_v19 }
 0x6b7   :  { %v1939_v18 = vpop.eup %1938 }
 0x6b8   :  { %500 = vrot.lane.b32.xlu0 %v1939_v18, %s2120_s26 }
 0x6b9   :  { %v1941_v20 = vpop.eup %1940 }
 0x6ba   :  { %v489_v21 = vadd.f32 1.0, %v1941_v20  ;;  %v758_v20 = vld [vmem:[#allocation4 + $0xa] sm:$0x3] }
 0x6bc   :  { %1942 = vrcp.f32 %v489_v21 }
 0x6c6   :  { %v1943_v22 = vpop.eup %1942 }
 0x6c7   :  { %v498_v25 = vmul.f32 %v1943_v22, %v496_v16 }
 0x72a   :  { %v501_v23 = vpop.permute.xlu0 %500 }
 0x72b   :  { %v503_v24 = vmul.f32 %v1943_v22, %v501_v23 }
 0x72d   :  { %505 = vrot.lane.b32.xlu0 %v503_v24, %s2121_s29 }
 0x79f   :  { %v506_v26 = vpop.permute.xlu0 %505 }
 0x7a0   :  { %v508_v27 = vadd.f32 %v506_v26, %v498_v25 }
 0x7a2   :  { %1944 = vtanh.f32 %v508_v27 }
 0x7ac   :  { %v1945_v28 = vpop.eup %1944 }
 0x7ad   :  { %511 = vrot.lane.b32.xlu1 %v1945_v28, %s2120_s26 }
 0x7b1   :  { %516 = vrot.lane.b32.xlu1 %v508_v27, %s2122_s2 }
 0x81f   :  { %v512_v29 = vpop.permute.xlu1 %511 }
 0x820   :  { %v514_v30 = vmul.f32 %v1943_v22, %v512_v29 }
 0x822   :  { %521 = vrot.lane.b32.xlu0 %v514_v30, %s2121_s29 }
 0x823   :  { %v517_v31 = vpop.permute.xlu1 %516 }
 0x824   :  { %519 = vst.msk [vmem:[#allocation3] sm:$0x3] %vm63_vm1, %v517_v31 }
 0x82b   :  { %v609_v32 = vld [vmem:[#allocation3] sm:$0x3] }
 0x82c   :  { %611 = vrot.lane.b32.xlu1 %v609_v32, %s2121_s29 }
 0x894   :  { %v522_v33 = vpop.permute.xlu0 %521 }
 0x895   :  { %524 = vst.msk [vmem:[#allocation2] sm:$0x3] %vm63_vm1, %v522_v33  ;;  %525 = vst.msk [vmem:[#allocation11 + $0x4] sm:$0x3] %vm63_vm1, %v522_v33 }
 0x89c   :  { %v527_v34 = vld [vmem:[#allocation2] sm:$0x3] }
 0x89d   :  { %1742 = vmatmul.mubr.msk.f32.vlgmr.msra.gmra.mrb[4].mxu1 %vm80_vm2, %v527_v34 }
 0x89e   :  { %1870 = vmatpush3.bf16.msra.mxu1 %v2211_v12  ;;  %1763 = vmatprep.mubr.msk.f32.mxu1 %vm2118_vm0, %v2119_v1  ;;  %v612_v46 = vpop.permute.xlu1 %611 }
 0x89f   :  { %1871 = vmatprep.subr.bf16.mxu1 %v2117_v0 }
 0x8a2   :  { %1873 = vmatpush3.bf16.msra.mxu1 %v2215_v13 }
 0x8a3   :  { %1880 = vmatprep.subr.bf16.mxu1 %v2117_v0 }
 0x970   :  { %v597_v36 = vpop.f32.mrb[4].mxu1 }
 0x971   :  { %v601_v37 = vadd.f32 %v597_v36, %v526_v35  ;;  %v1743_v38 = vpop.f32.mrb[5].mxu1 }
 0x973   :  { %1946 = vtanh.f32 %v601_v37  ;;  %v1599_v40 = vmul.f32 -1.442695, %v601_v37 }
 0x975   :  { %1948 = vpow2.f32 %v1599_v40 }
 0x97d   :  { %v1947_v39 = vpop.eup %1946 }
 0x97e   :  { %616 = vrot.lane.b32.xlu0 %v1947_v39, %s2120_s26 }
 0x97f   :  { %v1949_v41 = vpop.eup %1948 }
 0x980   :  { %v605_v42 = vadd.f32 1.0, %v1949_v41  ;;  %v874_v41 = vld [vmem:[#allocation4 + $0xc] sm:$0x3] }
 0x982   :  { %1950 = vrcp.f32 %v605_v42 }
 0x98c   :  { %v1951_v43 = vpop.eup %1950 }
 0x98d   :  { %v614_v47 = vmul.f32 %v1951_v43, %v612_v46 }
 0x9f0   :  { %v617_v44 = vpop.permute.xlu0 %616 }
 0x9f1   :  { %v619_v45 = vmul.f32 %v1951_v43, %v617_v44 }
 0x9f3   :  { %621 = vrot.lane.b32.xlu0 %v619_v45, %s2121_s29 }
 0xa65   :  { %v622_v48 = vpop.permute.xlu0 %621 }
 0xa66   :  { %v624_v49 = vadd.f32 %v622_v48, %v614_v47 }
 0xa68   :  { %1952 = vtanh.f32 %v624_v49 }
 0xa72   :  { %v1953_v50 = vpop.eup %1952 }
 0xa73   :  { %627 = vrot.lane.b32.xlu1 %v1953_v50, %s2120_s26 }
 0xa77   :  { %632 = vrot.lane.b32.xlu1 %v624_v49, %s2122_s2 }
 0xae5   :  { %v628_v51 = vpop.permute.xlu1 %627 }
 0xae6   :  { %v630_v52 = vmul.f32 %v1951_v43, %v628_v51 }
 0xae8   :  { %637 = vrot.lane.b32.xlu0 %v630_v52, %s2121_s29 }
 0xae9   :  { %v633_v53 = vpop.permute.xlu1 %632 }
 0xaea   :  { %635 = vst.msk [vmem:[#allocation3] sm:$0x3] %vm63_vm1, %v633_v53 }
 0xaf1   :  { %v725_v54 = vld [vmem:[#allocation3] sm:$0x3] }
 0xaf2   :  { %727 = vrot.lane.b32.xlu1 %v725_v54, %s2121_s29 }
 0xb5a   :  { %v638_v55 = vpop.permute.xlu0 %637 }
 0xb5b   :  { %640 = vst.msk [vmem:[#allocation2] sm:$0x3] %vm63_vm1, %v638_v55  ;;  %641 = vst.msk [vmem:[#allocation11 + $0x6] sm:$0x3] %vm63_vm1, %v638_v55 }
 0xb62   :  { %v643_v56 = vld [vmem:[#allocation2] sm:$0x3] }
 0xb63   :  { %1753 = vmatmul.mubr.msk.f32.vlgmr.msra.gmra.mrb[8].mxu0 %vm80_vm2, %v643_v56 }
 0xb64   :  { %1876 = vmatpush3.bf16.msra.mxu0 %v2211_v12  ;;  %1774 = vmatprep.mubr.msk.f32.mxu0 %vm2118_vm0, %v2119_v1  ;;  %v728_v6 = vpop.permute.xlu1 %727 }
 0xb65   :  { %1877 = vmatprep.subr.bf16.mxu0 %v2117_v0 }
 0xb68   :  { %1879 = vmatpush3.bf16.msra.mxu0 %v2215_v13 }
 0xb69   :  { %1886 = vmatprep.subr.bf16.mxu0 %v2117_v0 }
 0xc36   :  { %v713_v58 = vpop.f32.mrb[8].mxu0 }
 0xc37   :  { %v717_v59 = vadd.f32 %v713_v58, %v642_v57  ;;  %v1754_v60 = vpop.f32.mrb[9].mxu0 }
 0xc39   :  { %1954 = vtanh.f32 %v717_v59  ;;  %v1601_v62 = vmul.f32 -1.442695, %v717_v59 }
 0xc3b   :  { %1956 = vpow2.f32 %v1601_v62 }
 0xc43   :  { %v1955_v61 = vpop.eup %1954 }
 0xc44   :  { %732 = vrot.lane.b32.xlu0 %v1955_v61, %s2120_s26 }
 0xc45   :  { %v1957_v63 = vpop.eup %1956 }
 0xc46   :  { %v721_v2 = vadd.f32 1.0, %v1957_v63  ;;  %v990_v63 = vld [vmem:[#allocation4 + $0xe] sm:$0x3] }
 0xc48   :  { %1958 = vrcp.f32 %v721_v2 }
 0xc52   :  { %v1959_v3 = vpop.eup %1958 }
 0xc53   :  { %v730_v7 = vmul.f32 %v1959_v3, %v728_v6 }
 0xcb6   :  { %v733_v4 = vpop.permute.xlu0 %732 }
 0xcb7   :  { %v735_v5 = vmul.f32 %v1959_v3, %v733_v4 }
 0xcb9   :  { %737 = vrot.lane.b32.xlu0 %v735_v5, %s2121_s29 }
 0xd2b   :  { %v738_v8 = vpop.permute.xlu0 %737 }
 0xd2c   :  { %v740_v9 = vadd.f32 %v738_v8, %v730_v7 }
 0xd2e   :  { %1960 = vtanh.f32 %v740_v9 }
 0xd38   :  { %v1961_v10 = vpop.eup %1960 }
 0xd39   :  { %743 = vrot.lane.b32.xlu1 %v1961_v10, %s2120_s26 }
 0xd3d   :  { %748 = vrot.lane.b32.xlu1 %v740_v9, %s2122_s2 }
 0xdab   :  { %v744_v11 = vpop.permute.xlu1 %743 }
 0xdac   :  { %v746_v14 = vmul.f32 %v1959_v3, %v744_v11 }
 0xdae   :  { %753 = vrot.lane.b32.xlu0 %v746_v14, %s2121_s29 }
 0xdaf   :  { %v749_v15 = vpop.permute.xlu1 %748 }
 0xdb0   :  { %751 = vst.msk [vmem:[#allocation3] sm:$0x3] %vm63_vm1, %v749_v15 }
 0xdb7   :  { %v841_v17 = vld [vmem:[#allocation3] sm:$0x3] }
 0xdb8   :  { %843 = vrot.lane.b32.xlu1 %v841_v17, %s2121_s29 }
 0xe20   :  { %v754_v18 = vpop.permute.xlu0 %753 }
 0xe21   :  { %756 = vst.msk [vmem:[#allocation2] sm:$0x3] %vm63_vm1, %v754_v18  ;;  %757 = vst.msk [vmem:[#allocation11 + $0x8] sm:$0x3] %vm63_vm1, %v754_v18 }
 0xe28   :  { %v759_v19 = vld [vmem:[#allocation2] sm:$0x3] }
 0xe29   :  { %1764 = vmatmul.mubr.msk.f32.vlgmr.msra.gmra.mrb[6].mxu1 %vm80_vm2, %v759_v19 }
 0xe2a   :  { %1882 = vmatpush3.bf16.msra.mxu1 %v2211_v12  ;;  %1785 = vmatprep.mubr.msk.f32.mxu1 %vm2118_vm0, %v2119_v1  ;;  %v844_v30 = vpop.permute.xlu1 %843 }
 0xe2b   :  { %1883 = vmatprep.subr.bf16.mxu1 %v2117_v0 }
 0xe2e   :  { %1885 = vmatpush3.bf16.msra.mxu1 %v2215_v13 }
 0xe2f   :  { %1892 = vmatprep.subr.bf16.mxu1 %v2117_v0 }
 0xefc   :  { %v829_v21 = vpop.f32.mrb[6].mxu1 }
 0xefd   :  { %v833_v22 = vadd.f32 %v829_v21, %v758_v20  ;;  %v1765_v23 = vpop.f32.mrb[7].mxu1 }
 0xeff   :  { %1962 = vtanh.f32 %v833_v22  ;;  %v1603_v16 = vmul.f32 -1.442695, %v833_v22 }
 0xf01   :  { %1964 = vpow2.f32 %v1603_v16 }
 0xf09   :  { %v1963_v24 = vpop.eup %1962 }
 0xf0a   :  { %848 = vrot.lane.b32.xlu0 %v1963_v24, %s2120_s26 }
 0xf0b   :  { %v1965_v25 = vpop.eup %1964 }
 0xf0c   :  { %v837_v26 = vadd.f32 1.0, %v1965_v25  ;;  %v1106_v25 = vld [vmem:[#allocation4 + $0x10] sm:$0x3] }
 0xf0e   :  { %1966 = vrcp.f32 %v837_v26 }
 0xf18   :  { %v1967_v27 = vpop.eup %1966 }
 0xf19   :  { %v846_v31 = vmul.f32 %v1967_v27, %v844_v30 }
 0xf7c   :  { %v849_v28 = vpop.permute.xlu0 %848 }
 0xf7d   :  { %v851_v29 = vmul.f32 %v1967_v27, %v849_v28 }
 0xf7f   :  { %853 = vrot.lane.b32.xlu0 %v851_v29, %s2121_s29 }
 0xff1   :  { %v854_v32 = vpop.permute.xlu0 %853 }
 0xff2   :  { %v856_v33 = vadd.f32 %v854_v32, %v846_v31 }
 0xff4   :  { %1968 = vtanh.f32 %v856_v33 }
 0xffe   :  { %v1969_v34 = vpop.eup %1968 }
 0xfff   :  { %859 = vrot.lane.b32.xlu1 %v1969_v34, %s2120_s26 }
0x1003   :  { %864 = vrot.lane.b32.xlu1 %v856_v33, %s2122_s2 }
0x1071   :  { %v860_v35 = vpop.permute.xlu1 %859 }
0x1072   :  { %v862_v36 = vmul.f32 %v1967_v27, %v860_v35 }
0x1074   :  { %869 = vrot.lane.b32.xlu0 %v862_v36, %s2121_s29 }
0x1075   :  { %v865_v37 = vpop.permute.xlu1 %864 }
0x1076   :  { %867 = vst.msk [vmem:[#allocation3] sm:$0x3] %vm63_vm1, %v865_v37 }
0x107d   :  { %v957_v38 = vld [vmem:[#allocation3] sm:$0x3] }
0x107e   :  { %959 = vrot.lane.b32.xlu1 %v957_v38, %s2121_s29 }
0x10e6   :  { %v870_v39 = vpop.permute.xlu0 %869 }
0x10e7   :  { %872 = vst.msk [vmem:[#allocation2] sm:$0x3] %vm63_vm1, %v870_v39  ;;  %873 = vst.msk [vmem:[#allocation11 + $0xa] sm:$0x3] %vm63_vm1, %v870_v39 }
0x10ee   :  { %v875_v40 = vld [vmem:[#allocation2] sm:$0x3] }
0x10ef   :  { %1775 = vmatmul.mubr.msk.f32.vlgmr.msra.gmra.mrb[10].mxu0 %vm80_vm2, %v875_v40 }
0x10f0   :  { %1888 = vmatpush3.bf16.msra.mxu0 %v2211_v12  ;;  %1796 = vmatprep.mubr.msk.f32.mxu0 %vm2118_vm0, %v2119_v1  ;;  %v960_v52 = vpop.permute.xlu1 %959 }
0x10f1   :  { %1889 = vmatprep.subr.bf16.mxu0 %v2117_v0 }
0x10f4   :  { %1891 = vmatpush3.bf16.msra.mxu0 %v2215_v13 }
0x10f5   :  { %1898 = vmatprep.subr.bf16.mxu0 %v2117_v0 }
0x11c2   :  { %v945_v42 = vpop.f32.mrb[10].mxu0 }
0x11c3   :  { %v949_v43 = vadd.f32 %v945_v42, %v874_v41  ;;  %v1776_v44 = vpop.f32.mrb[11].mxu0 }
0x11c5   :  { %1970 = vtanh.f32 %v949_v43  ;;  %v1605_v46 = vmul.f32 -1.442695, %v949_v43 }
0x11c7   :  { %1972 = vpow2.f32 %v1605_v46 }
0x11cf   :  { %v1971_v45 = vpop.eup %1970 }
0x11d0   :  { %964 = vrot.lane.b32.xlu0 %v1971_v45, %s2120_s26 }
0x11d1   :  { %v1973_v47 = vpop.eup %1972 }
0x11d2   :  { %v953_v48 = vadd.f32 1.0, %v1973_v47  ;;  %v1222_v47 = vld [vmem:[#allocation4 + $0x12] sm:$0x3] }
0x11d4   :  { %1974 = vrcp.f32 %v953_v48 }
0x11de   :  { %v1975_v49 = vpop.eup %1974 }
0x11df   :  { %v962_v53 = vmul.f32 %v1975_v49, %v960_v52 }
0x1242   :  { %v965_v50 = vpop.permute.xlu0 %964 }
0x1243   :  { %v967_v51 = vmul.f32 %v1975_v49, %v965_v50 }
0x1245   :  { %969 = vrot.lane.b32.xlu0 %v967_v51, %s2121_s29 }
0x12b7   :  { %v970_v54 = vpop.permute.xlu0 %969 }
0x12b8   :  { %v972_v55 = vadd.f32 %v970_v54, %v962_v53 }
0x12ba   :  { %1976 = vtanh.f32 %v972_v55 }
0x12c4   :  { %v1977_v56 = vpop.eup %1976 }
0x12c5   :  { %975 = vrot.lane.b32.xlu1 %v1977_v56, %s2120_s26 }
0x12c9   :  { %980 = vrot.lane.b32.xlu1 %v972_v55, %s2122_s2 }
0x1337   :  { %v976_v57 = vpop.permute.xlu1 %975 }
0x1338   :  { %v978_v58 = vmul.f32 %v1975_v49, %v976_v57 }
0x133a   :  { %985 = vrot.lane.b32.xlu0 %v978_v58, %s2121_s29 }
0x133b   :  { %v981_v59 = vpop.permute.xlu1 %980 }
0x133c   :  { %983 = vst.msk [vmem:[#allocation3] sm:$0x3] %vm63_vm1, %v981_v59 }
0x1343   :  { %v1073_v60 = vld [vmem:[#allocation3] sm:$0x3] }
0x1344   :  { %1075 = vrot.lane.b32.xlu1 %v1073_v60, %s2121_s29 }
0x13ac   :  { %v986_v61 = vpop.permute.xlu0 %985 }
0x13ad   :  { %988 = vst.msk [vmem:[#allocation2] sm:$0x3] %vm63_vm1, %v986_v61  ;;  %989 = vst.msk [vmem:[#allocation11 + $0xc] sm:$0x3] %vm63_vm1, %v986_v61 }
0x13b4   :  { %v991_v62 = vld [vmem:[#allocation2] sm:$0x3] }
0x13b5   :  { %1786 = vmatmul.mubr.msk.f32.vlgmr.msra.gmra.mrb[8].mxu1 %vm80_vm2, %v991_v62 }
0x13b6   :  { %1894 = vmatpush3.bf16.msra.mxu1 %v2211_v12  ;;  %1807 = vmatprep.mubr.msk.f32.mxu1 %vm2118_vm0, %v2119_v1  ;;  %v1076_v14 = vpop.permute.xlu1 %1075 }
0x13b7   :  { %1895 = vmatprep.subr.bf16.mxu1 %v2117_v0 }
0x13ba   :  { %1897 = vmatpush3.bf16.msra.mxu1 %v2215_v13 }
0x13bb   :  { %1904 = vmatprep.subr.bf16.mxu1 %v2117_v0 }
0x1488   :  { %v1061_v2 = vpop.f32.mrb[8].mxu1 }
0x1489   :  { %v1065_v3 = vadd.f32 %v1061_v2, %v990_v63  ;;  %v1787_v4 = vpop.f32.mrb[9].mxu1 }
0x148b   :  { %1978 = vtanh.f32 %v1065_v3  ;;  %v1607_v6 = vmul.f32 -1.442695, %v1065_v3  ;;  %v1338_v3 = vld [vmem:[#allocation4 + $0x14] sm:$0x3] }
0x148d   :  { %1980 = vpow2.f32 %v1607_v6 }
0x1495   :  { %v1979_v5 = vpop.eup %1978 }
0x1496   :  { %1080 = vrot.lane.b32.xlu0 %v1979_v5, %s2120_s26 }
0x1497   :  { %v1981_v7 = vpop.eup %1980 }
0x1498   :  { %v1069_v8 = vadd.f32 1.0, %v1981_v7 }
0x149a   :  { %1982 = vrcp.f32 %v1069_v8 }
0x14a4   :  { %v1983_v9 = vpop.eup %1982 }
0x14a5   :  { %v1078_v15 = vmul.f32 %v1983_v9, %v1076_v14 }
0x1508   :  { %v1081_v10 = vpop.permute.xlu0 %1080 }
0x1509   :  { %v1083_v11 = vmul.f32 %v1983_v9, %v1081_v10 }
0x150b   :  { %1085 = vrot.lane.b32.xlu0 %v1083_v11, %s2121_s29 }
0x157d   :  { %v1086_v17 = vpop.permute.xlu0 %1085 }
0x157e   :  { %v1088_v18 = vadd.f32 %v1086_v17, %v1078_v15 }
0x1580   :  { %1984 = vtanh.f32 %v1088_v18 }
0x158a   :  { %v1985_v19 = vpop.eup %1984 }
0x158b   :  { %1091 = vrot.lane.b32.xlu1 %v1985_v19, %s2120_s26 }
0x158f   :  { %1096 = vrot.lane.b32.xlu1 %v1088_v18, %s2122_s2 }
0x15fd   :  { %v1092_v20 = vpop.permute.xlu1 %1091 }
0x15fe   :  { %v1094_v21 = vmul.f32 %v1983_v9, %v1092_v20 }
0x1600   :  { %1101 = vrot.lane.b32.xlu0 %v1094_v21, %s2121_s29 }
0x1601   :  { %v1097_v22 = vpop.permute.xlu1 %1096 }
0x1602   :  { %1099 = vst.msk [vmem:[#allocation3] sm:$0x3] %vm63_vm1, %v1097_v22 }
0x1609   :  { %v1189_v23 = vld [vmem:[#allocation3] sm:$0x3] }
0x160a   :  { %1191 = vrot.lane.b32.xlu1 %v1189_v23, %s2121_s29 }
0x1672   :  { %v1102_v24 = vpop.permute.xlu0 %1101 }
0x1673   :  { %1104 = vst.msk [vmem:[#allocation2] sm:$0x3] %vm63_vm1, %v1102_v24  ;;  %1105 = vst.msk [vmem:[#allocation11 + $0xe] sm:$0x3] %vm63_vm1, %v1102_v24 }
0x167a   :  { %v1107_v16 = vld [vmem:[#allocation2] sm:$0x3] }
0x167b   :  { %1797 = vmatmul.mubr.msk.f32.vlgmr.msra.gmra.mrb[12].mxu0 %vm80_vm2, %v1107_v16 }
0x167c   :  { %1900 = vmatpush3.bf16.msra.mxu0 %v2211_v12  ;;  %1818 = vmatprep.mubr.msk.f32.mxu0 %vm2118_vm0, %v2119_v1  ;;  %v1192_v36 = vpop.permute.xlu1 %1191 }
0x167d   :  { %1901 = vmatprep.subr.bf16.mxu0 %v2117_v0 }
0x1680   :  { %1903 = vmatpush3.bf16.msra.mxu0 %v2215_v13 }
0x174e   :  { %v1177_v26 = vpop.f32.mrb[12].mxu0 }
0x174f   :  { %v1181_v27 = vadd.f32 %v1177_v26, %v1106_v25  ;;  %v1798_v28 = vpop.f32.mrb[13].mxu0 }
0x1751   :  { %1986 = vtanh.f32 %v1181_v27  ;;  %v1609_v30 = vmul.f32 -1.442695, %v1181_v27  ;;  %v1454_v27 = vld [vmem:[#allocation4 + $0x16] sm:$0x3] }
0x1753   :  { %1988 = vpow2.f32 %v1609_v30 }
0x175b   :  { %v1987_v29 = vpop.eup %1986 }
0x175c   :  { %1196 = vrot.lane.b32.xlu0 %v1987_v29, %s2120_s26 }
0x175d   :  { %v1989_v31 = vpop.eup %1988 }
0x175e   :  { %v1185_v32 = vadd.f32 1.0, %v1989_v31 }
0x1760   :  { %1990 = vrcp.f32 %v1185_v32 }
0x176a   :  { %v1991_v33 = vpop.eup %1990 }
0x176b   :  { %v1194_v37 = vmul.f32 %v1991_v33, %v1192_v36 }
0x17ce   :  { %v1197_v34 = vpop.permute.xlu0 %1196 }
0x17cf   :  { %v1199_v35 = vmul.f32 %v1991_v33, %v1197_v34 }
0x17d1   :  { %1201 = vrot.lane.b32.xlu0 %v1199_v35, %s2121_s29 }
0x1843   :  { %v1202_v38 = vpop.permute.xlu0 %1201 }
0x1844   :  { %v1204_v39 = vadd.f32 %v1202_v38, %v1194_v37 }
0x1846   :  { %1992 = vtanh.f32 %v1204_v39 }
0x1850   :  { %v1993_v40 = vpop.eup %1992 }
0x1851   :  { %1207 = vrot.lane.b32.xlu1 %v1993_v40, %s2120_s26 }
0x1855   :  { %1212 = vrot.lane.b32.xlu1 %v1204_v39, %s2122_s2 }
0x18c3   :  { %v1208_v41 = vpop.permute.xlu1 %1207 }
0x18c4   :  { %v1210_v42 = vmul.f32 %v1991_v33, %v1208_v41 }
0x18c6   :  { %1217 = vrot.lane.b32.xlu0 %v1210_v42, %s2121_s29 }
0x18c7   :  { %v1213_v43 = vpop.permute.xlu1 %1212 }
0x18c8   :  { %1215 = vst.msk [vmem:[#allocation3] sm:$0x3] %vm63_vm1, %v1213_v43 }
0x18cf   :  { %v1305_v44 = vld [vmem:[#allocation3] sm:$0x3] }
0x18d0   :  { %1307 = vrot.lane.b32.xlu1 %v1305_v44, %s2121_s29 }
0x1938   :  { %v1218_v45 = vpop.permute.xlu0 %1217 }
0x1939   :  { %1221 = vst.msk [vmem:[#allocation11 + $0x10] sm:$0x3] %vm63_vm1, %v1218_v45  ;;  %1220 = vst.msk [vmem:[#allocation2] sm:$0x3] %vm63_vm1, %v1218_v45 }
0x1940   :  { %v1223_v46 = vld [vmem:[#allocation2] sm:$0x3] }
0x1941   :  { %1808 = vmatmul.mubr.msk.f32.vlgmr.msra.gmra.mrb[10].mxu1 %vm80_vm2, %v1223_v46 }
0x1942   :  { %1906 = vmatpush3.bf16.msra.mxu1 %v2211_v12  ;;  %1829 = vmatprep.mubr.msk.f32.mxu1 %vm2118_vm0, %v2119_v1 }
0x1943   :  { %1907 = vmatprep.subr.bf16.mxu1 %v2117_v0  ;;  %v1308_v0 = vpop.permute.xlu1 %1307 }
0x1946   :  { %1909 = vmatpush3.bf16.msra.mxu1 %v2215_v13 }
0x1a14   :  { %v1293_v48 = vpop.f32.mrb[10].mxu1 }
0x1a15   :  { %v1297_v49 = vadd.f32 %v1293_v48, %v1222_v47  ;;  %v1809_v50 = vpop.f32.mrb[11].mxu1 }
0x1a17   :  { %1994 = vtanh.f32 %v1297_v49  ;;  %v1611_v52 = vmul.f32 -1.442695, %v1297_v49 }
0x1a19   :  { %1996 = vpow2.f32 %v1611_v52 }
0x1a21   :  { %v1995_v51 = vpop.eup %1994 }
0x1a22   :  { %1312 = vrot.lane.b32.xlu0 %v1995_v51, %s2120_s26 }
0x1a23   :  { %v1997_v53 = vpop.eup %1996 }
0x1a24   :  { %v1301_v54 = vadd.f32 1.0, %v1997_v53 }
0x1a26   :  { %1998 = vrcp.f32 %v1301_v54 }
0x1a30   :  { %v1999_v12 = vpop.eup %1998 }
0x1a31   :  { %v1310_v13 = vmul.f32 %v1999_v12, %v1308_v0 }
0x1a94   :  { %v1313_v55 = vpop.permute.xlu0 %1312 }
0x1a95   :  { %v1315_v1 = vmul.f32 %v1999_v12, %v1313_v55 }
0x1a97   :  { %1317 = vrot.lane.b32.xlu0 %v1315_v1, %s2121_s29 }
0x1b09   :  { %v1318_v56 = vpop.permute.xlu0 %1317 }
0x1b0a   :  { %v1320_v57 = vadd.f32 %v1318_v56, %v1310_v13 }
0x1b0c   :  { %2000 = vtanh.f32 %v1320_v57 }
0x1b16   :  { %v2001_v58 = vpop.eup %2000 }
0x1b17   :  { %1323 = vrot.lane.b32.xlu1 %v2001_v58, %s2120_s26 }
0x1b1b   :  { %1328 = vrot.lane.b32.xlu1 %v1320_v57, %s2122_s2 }
0x1b89   :  { %v1324_v59 = vpop.permute.xlu1 %1323 }
0x1b8a   :  { %v1326_v60 = vmul.f32 %v1999_v12, %v1324_v59 }
0x1b8c   :  { %1333 = vrot.lane.b32.xlu0 %v1326_v60, %s2121_s29 }
0x1b8d   :  { %v1329_v61 = vpop.permute.xlu1 %1328 }
0x1b8e   :  { %1331 = vst.msk [vmem:[#allocation3] sm:$0x3] %vm63_vm1, %v1329_v61 }
0x1b95   :  { %v1421_v62 = vld [vmem:[#allocation3] sm:$0x3] }
0x1b96   :  { %1423 = vrot.lane.b32.xlu1 %v1421_v62, %s2121_s29 }
0x1bfe   :  { %v1334_v63 = vpop.permute.xlu0 %1333 }
0x1bff   :  { %1337 = vst.msk [vmem:[#allocation11 + $0x12] sm:$0x3] %vm63_vm1, %v1334_v63  ;;  %1336 = vst.msk [vmem:[#allocation2] sm:$0x3] %vm63_vm1, %v1334_v63 }
0x1c06   :  { %v1339_v2 = vld [vmem:[#allocation2] sm:$0x3] }
0x1c07   :  { %1819 = vmatmul.mubr.msk.f32.vlgmr.msra.gmra.mrb[14].mxu0 %vm80_vm2, %v1339_v2 }
0x1c08   :  { %v1424_v17 = vpop.permute.xlu1 %1423 }
0x1cda   :  { %v1409_v4 = vpop.f32.mrb[14].mxu0 }
0x1cdb   :  { %v1413_v5 = vadd.f32 %v1409_v4, %v1338_v3  ;;  %v1820_v6 = vpop.f32.mrb[15].mxu0 }
0x1cdd   :  { %2002 = vtanh.f32 %v1413_v5  ;;  %v1613_v8 = vmul.f32 -1.442695, %v1413_v5 }
0x1cdf   :  { %2004 = vpow2.f32 %v1613_v8 }
0x1ce7   :  { %v2003_v7 = vpop.eup %2002 }
0x1ce8   :  { %1428 = vrot.lane.b32.xlu0 %v2003_v7, %s2120_s26 }
0x1ce9   :  { %v2005_v9 = vpop.eup %2004 }
0x1cea   :  { %v1417_v10 = vadd.f32 1.0, %v2005_v9 }
0x1cec   :  { %2006 = vrcp.f32 %v1417_v10 }
0x1cf6   :  { %v2007_v11 = vpop.eup %2006 }
0x1cf7   :  { %v1426_v18 = vmul.f32 %v2007_v11, %v1424_v17 }
0x1d5a   :  { %v1429_v14 = vpop.permute.xlu0 %1428 }
0x1d5b   :  { %v1431_v15 = vmul.f32 %v2007_v11, %v1429_v14 }
0x1d5d   :  { %1433 = vrot.lane.b32.xlu0 %v1431_v15, %s2121_s29 }
0x1dcf   :  { %v1434_v19 = vpop.permute.xlu0 %1433 }
0x1dd0   :  { %v1436_v20 = vadd.f32 %v1434_v19, %v1426_v18 }
0x1dd2   :  { %2008 = vtanh.f32 %v1436_v20 }
0x1ddc   :  { %v2009_v21 = vpop.eup %2008 }
0x1ddd   :  { %1439 = vrot.lane.b32.xlu1 %v2009_v21, %s2120_s26 }
0x1de1   :  { %1444 = vrot.lane.b32.xlu1 %v1436_v20, %s2122_s2 }
0x1e4f   :  { %v1440_v22 = vpop.permute.xlu1 %1439 }
0x1e50   :  { %v1442_v23 = vmul.f32 %v2007_v11, %v1440_v22 }
0x1e52   :  { %1449 = vrot.lane.b32.xlu0 %v1442_v23, %s2121_s29 }
0x1e53   :  { %v1445_v24 = vpop.permute.xlu1 %1444 }
0x1e54   :  { %1447 = vst.msk [vmem:[#allocation3] sm:$0x3] %vm63_vm1, %v1445_v24 }
0x1e5b   :  { %v1537_v16 = vld [vmem:[#allocation3] sm:$0x3] }
0x1e5c   :  { %1539 = vrot.lane.b32.xlu1 %v1537_v16, %s2121_s29 }
0x1ec4   :  { %v1450_v25 = vpop.permute.xlu0 %1449 }
0x1ec5   :  { %1453 = vst.msk [vmem:[#allocation11 + $0x14] sm:$0x3] %vm63_vm1, %v1450_v25  ;;  %1452 = vst.msk [vmem:[#allocation2] sm:$0x3] %vm63_vm1, %v1450_v25 }
0x1ecc   :  { %v1455_v26 = vld [vmem:[#allocation2] sm:$0x3] }
0x1ecd   :  { %1830 = vmatmul.mubr.msk.f32.vlgmr.msra.gmra.mrb[12].mxu1 %vm80_vm2, %v1455_v26 }
0x1ece   :  { %v1540_v38 = vpop.permute.xlu1 %1539 }
0x1fa0   :  { %v1525_v28 = vpop.f32.mrb[12].mxu1 }
0x1fa1   :  { %v1529_v29 = vadd.f32 %v1525_v28, %v1454_v27  ;;  %v1831_v30 = vpop.f32.mrb[13].mxu1 }
0x1fa3   :  { %2010 = vtanh.f32 %v1529_v29  ;;  %v1615_v32 = vmul.f32 -1.442695, %v1529_v29 }
0x1fa5   :  { %2012 = vpow2.f32 %v1615_v32 }
0x1fad   :  { %v2011_v31 = vpop.eup %2010 }
0x1fae   :  { %1544 = vrot.lane.b32.xlu0 %v2011_v31, %s2120_s26 }
0x1faf   :  { %v2013_v33 = vpop.eup %2012 }
0x1fb0   :  { %v1533_v34 = vadd.f32 1.0, %v2013_v33 }
0x1fb2   :  { %2014 = vrcp.f32 %v1533_v34 }
0x1fbc   :  { %v2015_v35 = vpop.eup %2014 }
0x1fbd   :  { %v1542_v39 = vmul.f32 %v2015_v35, %v1540_v38 }
0x2020   :  { %v1545_v36 = vpop.permute.xlu0 %1544 }
0x2021   :  { %v1547_v37 = vmul.f32 %v2015_v35, %v1545_v36 }
0x2023   :  { %1549 = vrot.lane.b32.xlu0 %v1547_v37, %s2121_s29 }
0x2095   :  { %v1550_v40 = vpop.permute.xlu0 %1549 }
0x2096   :  { %v1552_v41 = vadd.f32 %v1550_v40, %v1542_v39 }
0x2098   :  { %2016 = vtanh.f32 %v1552_v41 }
0x20a2   :  { %v2017_v42 = vpop.eup %2016 }
0x20a3   :  { %1555 = vrot.lane.b32.xlu1 %v2017_v42, %s2120_s26 }
0x20a7   :  { %1560 = vrot.lane.b32.xlu1 %v1552_v41, %s2122_s2 }
0x2115   :  { %v1556_v43 = vpop.permute.xlu1 %1555 }
0x2116   :  { %v1558_v44 = vmul.f32 %v2015_v35, %v1556_v43 }
0x2118   :  { %1565 = vrot.lane.b32.xlu0 %v1558_v44, %s2121_s29 }
0x2119   :  { %v1561_v45 = vpop.permute.xlu1 %1560 }
0x211a   :  { %1563 = vst.msk [vmem:[#allocation3] sm:$0x3] %vm63_vm1, %v1561_v45 }
0x218a   :  { %v1566_v46 = vpop.permute.xlu0 %1565 }
0x218b   :  { %1568 = vst.msk [vmem:[#allocation2] sm:$0x3] %vm63_vm1, %v1566_v46  ;;  %1569 = vst.msk [vmem:[#allocation11 + $0x16] sm:$0x3] %vm63_vm1, %v1566_v46 }
0x218c   :  { %2095 = shalt.err (!%p2092_p0)
}
0x218d   :  { %s2096_s9 = scalar_lea.hbm %s2439_s4, 384 }
0x218e   :  { %p2097_p1 = scmp.ne.s32.totalorder %s2439_s4, %s2096_s9  ;;  %p2100_p2 = scmp.lt.u32.totalorder %s2096_s9, %s2439_s4 }
0x2190   :  { %p2102_p3 = pnand %p2100_p2, %p2097_p1 }
0x2192   :  { %2105 = shalt.err (!%p2102_p3)
}
0x2193   :  { %1581 = dma.vmem_to_hbm [thread:$0]  %s1576_s5, 384, %s2439_s4, [#allocation7], %s2114_s27, %s2114_s27, %s2115_s28  }
0x2194   :  { %2110 = dma.done.wait [#allocation7], 384  }
0x2195   :  { %2111 = vsyncadd [#allocation7], 4294966912 }
0x2196   :  { %1585 = vsyncpa [#allocation6], 1 }
0x2197   :  { %1586 = vsyncpa [#allocation9], 1 }
0x2198   :  { %1587 = vsyncpa [#allocation7], 1 }

</bundles_post_ra>
